<compile_context>
chip_gen: v7x
topology: tpu7x:2x2x1
jax: 0.10.0
libtpu: 0.0.40
codegen_flags: <defaults>
</compile_context>

<pallas_src>
import jax
import jax.numpy as jnp
from jax.experimental import pallas as pl
from jax.experimental.pallas import tpu as pltpu

IN_FEATURES = 1024
HIDDEN = 512
OUT_FEATURES = 11
OUT_PAD = 128      # lane-dense padded output width (>= 11, multiple of 128)
TILE_B = 128       # batch rows per grid step


def mlp_kernel(x_ref, w1_ref, b1_ref, w2_ref, b2_ref, o_ref):
    # x_ref:  [TILE_B, 1024] bf16   (streams per grid step)
    # w1_ref: [1024, 512]    bf16   (VMEM-resident across grid steps)
    # b1_ref: [1, 512]       f32
    # w2_ref: [512, 128]     bf16   (zero-padded past column 11)
    # b2_ref: [1, 128]       f32
    # o_ref:  [TILE_B, 128]  f32
    x = x_ref[...]
    # MXU matmul: bf16 operands, f32 accumulation.
    h = jnp.dot(x, w1_ref[...], preferred_element_type=jnp.float32) + b1_ref[...]
    h = jnp.maximum(h, 0.0)              # ReLU in f32 on the VPU
    h = h.astype(jnp.bfloat16)           # MXU-native input for the 2nd matmul
    out = jnp.dot(h, w2_ref[...], preferred_element_type=jnp.float32) + b2_ref[...]
    o_ref[...] = out.astype(o_ref.dtype)  # lane-dense (128-wide) unmasked store


@jax.jit
def classifier_forward(x, w1, b1, w2, b2):
    """x: [B, C, H, W] with C*H*W == 1024 (or already [B, 1024]) -> [B, 11] f32."""
    B = x.shape[0]
    x_flat = x.reshape(B, -1).astype(jnp.bfloat16)   # like x.view(B, -1)
    B_pad = pl.cdiv(B, TILE_B) * TILE_B
    if B_pad != B:
        x_flat = jnp.pad(x_flat, ((0, B_pad - B), (0, 0)))

    cost = pl.CostEstimate(
        flops=2 * B_pad * (IN_FEATURES * HIDDEN + HIDDEN * OUT_PAD),
        transcendentals=0,
        bytes_accessed=(
            (IN_FEATURES * HIDDEN + HIDDEN * OUT_PAD) * 2   # bf16 weights
            + (HIDDEN + OUT_PAD) * 4                        # f32 biases
            + B_pad * IN_FEATURES * 2                       # bf16 activations in
            + B_pad * OUT_PAD * 4                           # f32 logits out
        ),
    )

    out_pad = pl.pallas_call(
        mlp_kernel,
        out_shape=jax.ShapeDtypeStruct((B_pad, OUT_PAD), jnp.float32),
        grid=(B_pad // TILE_B,),
        in_specs=[
            pl.BlockSpec((TILE_B, IN_FEATURES), lambda i: (i, 0)),   # x tile streams
            pl.BlockSpec((IN_FEATURES, HIDDEN), lambda i: (0, 0)),   # W1 resident
            pl.BlockSpec((1, HIDDEN), lambda i: (0, 0)),             # b1 resident
            pl.BlockSpec((HIDDEN, OUT_PAD), lambda i: (0, 0)),       # W2 resident
            pl.BlockSpec((1, OUT_PAD), lambda i: (0, 0)),            # b2 resident
        ],
        out_specs=pl.BlockSpec((TILE_B, OUT_PAD), lambda i: (i, 0)),
        compiler_params=pltpu.CompilerParams(
            dimension_semantics=("parallel",),   # shard batch across TCs on v7x
        ),
        cost_estimate=cost,
    )(x_flat, w1, b1, w2, b2)

    return out_pad[:B, :OUT_FEATURES]


def init_params(key):
    """Deterministic init matching nn.Linear defaults (transposed layout)."""
    k1, k2, k3, k4 = jax.random.split(key, 4)
    bound1 = 1.0 / jnp.sqrt(IN_FEATURES)
    bound2 = 1.0 / jnp.sqrt(HIDDEN)
    w1 = jax.random.uniform(k1, (IN_FEATURES, HIDDEN), jnp.float32, -bound1, bound1)
    b1 = jax.random.uniform(k2, (1, HIDDEN), jnp.float32, -bound1, bound1)
    w2 = jax.random.uniform(k3, (HIDDEN, OUT_FEATURES), jnp.float32, -bound2, bound2)
    b2 = jax.random.uniform(k4, (1, OUT_FEATURES), jnp.float32, -bound2, bound2)
    # Lane-pad the 11-wide output layer to 128 columns (zero cols contribute 0).
    w2_p = jnp.zeros((HIDDEN, OUT_PAD), jnp.float32).at[:, :OUT_FEATURES].set(w2)
    b2_p = jnp.zeros((1, OUT_PAD), jnp.float32).at[:, :OUT_FEATURES].set(b2)
    # bf16 weights halve HBM->VMEM traffic; biases stay f32 (tiny).
    return w1.astype(jnp.bfloat16), b1, w2_p.astype(jnp.bfloat16), b2_p


if __name__ == "__main__":
    key = jax.random.PRNGKey(0)
    k_x, k_p = jax.random.split(key)

    # Input consistent with flattening to 1024 features: [2, 4, 16, 16] NCHW.
    x = jax.random.normal(k_x, (2, 4, 16, 16), dtype=jnp.float32)
    w1, b1, w2, b2 = init_params(k_p)

    out = classifier_forward(x, w1, b1, w2, b2)
    out = jax.block_until_ready(out)

    # Pure-JAX reference mirroring the kernel's bf16 operand casts.
    xf = x.reshape(x.shape[0], -1).astype(jnp.bfloat16).astype(jnp.float32)
    h_ref = jnp.maximum(xf @ w1.astype(jnp.float32) + b1, 0.0)
    h_ref = h_ref.astype(jnp.bfloat16).astype(jnp.float32)
    ref = (h_ref @ w2.astype(jnp.float32) + b2)[:, :OUT_FEATURES]

    assert out.shape == (2, OUT_FEATURES)
    assert jnp.allclose(out, ref, atol=1e-2, rtol=1e-2)

    print("KERNEL_OK")
</pallas_src>

<mosaic_0001>
module attributes {stable_mosaic.version = 11 : i64} {
  func.func @mlp_kernel(%arg0: i32, %arg1: memref<128x1024xbf16, #tpu.memory_space<vmem>>, %arg2: memref<1024x512xbf16, #tpu.memory_space<vmem>>, %arg3: memref<1x512xf32, #tpu.memory_space<vmem>>, %arg4: memref<512x128xbf16, #tpu.memory_space<vmem>>, %arg5: memref<1x128xf32, #tpu.memory_space<vmem>>, %arg6: memref<128x128xf32, #tpu.memory_space<vmem>>) attributes {dimension_semantics = [#tpu.dimension_semantics<parallel>], iteration_bounds = array<i64: 1>, scalar_prefetch = 0 : i64, scratch_operands = 0 : i64, tpu.core_type = #tpu.core_type<tc>, window_params = [{transform_indices = @transform_0, window_bounds = array<i64: 128, 1024>}, {pipeline_mode = #tpu.pipeline_mode<synchronous>, transform_indices = @transform_1, window_bounds = array<i64: 1024, 512>}, {pipeline_mode = #tpu.pipeline_mode<synchronous>, transform_indices = @transform_2, window_bounds = array<i64: 1, 512>}, {pipeline_mode = #tpu.pipeline_mode<synchronous>, transform_indices = @transform_3, window_bounds = array<i64: 512, 128>}, {pipeline_mode = #tpu.pipeline_mode<synchronous>, transform_indices = @transform_4, window_bounds = array<i64: 1, 128>}, {transform_indices = @transform_5, window_bounds = array<i64: 128, 128>}]} {
    %c0 = arith.constant 0 : index
    %c0_0 = arith.constant 0 : index
    %0 = vector.load %arg1[%c0, %c0_0] : memref<128x1024xbf16, #tpu.memory_space<vmem>>, vector<128x1024xbf16>
    %c0_1 = arith.constant 0 : index
    %c0_2 = arith.constant 0 : index
    %1 = vector.load %arg2[%c0_1, %c0_2] : memref<1024x512xbf16, #tpu.memory_space<vmem>>, vector<1024x512xbf16>
    %cst = arith.constant dense<0.000000e+00> : vector<128x512xf32>
    %2 = tpu.matmul %0, %1, %cst {dimension_numbers = #tpu.dot_dimension_numbers<[1], [0], [0], [1], [0, 0, 1, 1], [], []>} : vector<128x1024xbf16>, vector<1024x512xbf16>, vector<128x512xf32> -> vector<128x512xf32>
    %c0_3 = arith.constant 0 : index
    %c0_4 = arith.constant 0 : index
    %3 = vector.load %arg3[%c0_3, %c0_4] : memref<1x512xf32, #tpu.memory_space<vmem>>, vector<1x512xf32>
    %4 = vector.broadcast %3 : vector<1x512xf32> to vector<128x512xf32>
    %5 = arith.addf %2, %4 : vector<128x512xf32>
    %cst_5 = arith.constant 0.000000e+00 : f32
    %6 = vector.broadcast %cst_5 : f32 to vector<128x512xf32>
    %7 = arith.maximumf %5, %6 : vector<128x512xf32>
    %8 = arith.truncf %7 : vector<128x512xf32> to vector<128x512xbf16>
    %c0_6 = arith.constant 0 : index
    %c0_7 = arith.constant 0 : index
    %9 = vector.load %arg4[%c0_6, %c0_7] : memref<512x128xbf16, #tpu.memory_space<vmem>>, vector<512x128xbf16>
    %cst_8 = arith.constant dense<0.000000e+00> : vector<128x128xf32>
    %10 = tpu.matmul %8, %9, %cst_8 {dimension_numbers = #tpu.dot_dimension_numbers<[1], [0], [0], [1], [0, 0, 1, 1], [], []>} : vector<128x512xbf16>, vector<512x128xbf16>, vector<128x128xf32> -> vector<128x128xf32>
    %c0_9 = arith.constant 0 : index
    %c0_10 = arith.constant 0 : index
    %11 = vector.load %arg5[%c0_9, %c0_10] : memref<1x128xf32, #tpu.memory_space<vmem>>, vector<1x128xf32>
    %12 = vector.broadcast %11 : vector<1x128xf32> to vector<128x128xf32>
    %13 = arith.addf %10, %12 : vector<128x128xf32>
    %c0_11 = arith.constant 0 : index
    %c0_12 = arith.constant 0 : index
    %14 = vector.load %arg6[%c0_11, %c0_12] : memref<128x128xf32, #tpu.memory_space<vmem>>, vector<128x128xf32>
    tpu.vector_store %arg6[%c0_11, %c0_12], %13 {strides = array<i32>} : memref<128x128xf32, #tpu.memory_space<vmem>>, vector<128x128xf32>,
    return
  }
  func.func @transform_0(%arg0: i32) -> (i32, i32) {
    %c0_i32 = arith.constant 0 : i32
    %c0_i32_0 = arith.constant 0 : i32
    return %arg0, %c0_i32 : i32, i32
  }
  func.func @transform_1(%arg0: i32) -> (i32, i32) {
    %c0_i32 = arith.constant 0 : i32
    %c0_i32_0 = arith.constant 0 : i32
    %c0_i32_1 = arith.constant 0 : i32
    return %c0_i32, %c0_i32_0 : i32, i32
  }
  func.func @transform_2(%arg0: i32) -> (i32, i32) {
    %c0_i32 = arith.constant 0 : i32
    %c0_i32_0 = arith.constant 0 : i32
    %c0_i32_1 = arith.constant 0 : i32
    return %c0_i32, %c0_i32_0 : i32, i32
  }
  func.func @transform_3(%arg0: i32) -> (i32, i32) {
    %c0_i32 = arith.constant 0 : i32
    %c0_i32_0 = arith.constant 0 : i32
    %c0_i32_1 = arith.constant 0 : i32
    return %c0_i32, %c0_i32_0 : i32, i32
  }
  func.func @transform_4(%arg0: i32) -> (i32, i32) {
    %c0_i32 = arith.constant 0 : i32
    %c0_i32_0 = arith.constant 0 : i32
    %c0_i32_1 = arith.constant 0 : i32
    return %c0_i32, %c0_i32_0 : i32, i32
  }
  func.func @transform_5(%arg0: i32) -> (i32, i32) {
    %c0_i32 = arith.constant 0 : i32
    %c0_i32_0 = arith.constant 0 : i32
    return %arg0, %c0_i32 : i32, i32
  }
}

</mosaic_0001>

<bundles_post_ra>
// kernel: classifier_forward.1
= control target key start
LH: loop header
LB: loop body
LE: loop exit
PB: predicated region body
PF: predicated region fallthrough
CT: control target
= control target key end

     0   :  { %10 = vsyncpa [#allocation3], 0  ;;  %s4635_s18 = smov [#allocation2]   ;;  %s5112_s0 = inlined_call_operand.vmem [shape: bf16[128,1024], index: 0, kind: input, shape index: {}]   ;;  %s5113_s1 = inlined_call_operand.hbm [shape: bf16[1024,512], index: 1, kind: input, shape index: {}]   ;;  %s5114_s2 = inlined_call_operand.vmem [shape: f32[1,512], index: 2, kind: input, shape index: {}]   ;;  %s5115_s3 = inlined_call_operand.vmem [shape: bf16[512,128], index: 3, kind: input, shape index: {}]   ;;  %s5116_s4 = inlined_call_operand.vmem [shape: f32[1,128], index: 4, kind: input, shape index: {}]   ;;  %s5117_s5 = inlined_call_operand.vmem [shape: f32[128,128], index: 5, kind: output, shape index: {}]  }
   0x1   :  { %s18_s19 = sshll.u32 %s4635_s18, 4  ;;  %s4611_s22 = scalar_lea.hbm %s5113_s1, 32768  ;;  %s19_s19 = int_to_ptr.vmem [resolvable:$true] %s18_s19 }
   0x2   :  { %p4612_p0 = scmp.ne.s32.totalorder %s5113_s1, %s4611_s22  ;;  %p4615_p1 = scmp.lt.u32.totalorder %s4611_s22, %s5113_s1 }
   0x4   :  { %p4617_p2 = pnand %p4615_p1, %p4612_p0 }
   0x6   :  { %4620 = shalt.err (!%p4617_p2)
}
   0x7   :  { %s4621_s27 = scalar_lea.vmem %s19_s19, 32768  ;;  %p4626_p4 = scmp.lt.s32.totalorder %s19_s19, %s19_s19 }
   0x8   :  { %p4622_p3 = scmp.ne.s32.totalorder %s19_s19, %s4621_s27  ;;  %p4627_p5 = scmp.lt.s32.totalorder %s4621_s27, %s4621_s27 }
   0xa   :  { %p4628_p6 = por %p4627_p5, %p4626_p4 }
   0xc   :  { %p4629_p7 = pnand %p4628_p6, %p4622_p3 }
   0xe   :  { %4632 = shalt.err (!%p4629_p7)
}
   0xf   :  { %s4636_s28 = smov 256   ;;  %s4637_s29 = smov 16  }
  0x10   :  { %24 = dma.hbm_to_vmem [thread:$0]  %s5113_s1, 32768, %s19_s19, [#allocation3], %s4636_s28, %s4636_s28, %s4637_s29  }
  0x11   :  { %4633 = dma.done.wait [#allocation3], 32768  }
  0x12   :  { %4634 = vsyncadd [#allocation3], 4294934528  ;;  %v4195_v0 = vld [vmem:[#allocation2 + $0x4] ss:$16 sps:$4 sm:$0xff]   ;;  %v4197_v1 = vld [vmem:[#allocation2 + $0xc] ss:$16 sps:$4 sm:$0xff]  }
  0x13   :  { %1977 = vmatprep.subr.bf16.mxu0 %v4195_v0  ;;  %v4199_v2 = vld [vmem:[#allocation2] ss:$16 sps:$4 sm:$0xff]   ;;  %v4200_v3 = vld [vmem:[#allocation2 + $0x8] ss:$16 sps:$4 sm:$0xff]   ;;  %2429 = vmatprep.subr.bf16.mxu1 %v4197_v1  ;;  %v4201_v4 = vld [vmem:[#allocation2 + $0x24] ss:$16 sps:$4 sm:$0xff]  }
  0x14   :  { %1978 = vmatpush1.bf16.msra.mxu0 %v4199_v2  ;;  %2430 = vmatpush1.bf16.msra.mxu1 %v4200_v3  ;;  %v4203_v5 = vld [vmem:[#allocation2 + $0x2c] ss:$16 sps:$4 sm:$0xff]   ;;  %v4205_v6 = vld [vmem:[#allocation2 + $0x20] ss:$16 sps:$4 sm:$0xff]   ;;  %v4206_v7 = vld [vmem:[#allocation2 + $0x28] ss:$16 sps:$4 sm:$0xff]  }
  0x15   :  { %1979 = vmatprep.subr.bf16.mxu0 %v4201_v4  ;;  %2431 = vmatprep.subr.bf16.mxu1 %v4203_v5  ;;  %v4207_v8 = vld [vmem:[#allocation2 + $0x44] ss:$16 sps:$4 sm:$0xff]   ;;  %v4209_v9 = vld [vmem:[#allocation2 + $0x4c] ss:$16 sps:$4 sm:$0xff]   ;;  %v4211_v10 = vld [vmem:[#allocation2 + $0x40] ss:$16 sps:$4 sm:$0xff]  }
  0x16   :  { %v4212_v11 = vld [vmem:[#allocation2 + $0x48] ss:$16 sps:$4 sm:$0xff]   ;;  %v4213_v12 = vld [vmem:[#allocation2 + $0x64] ss:$16 sps:$4 sm:$0xff]   ;;  %v4215_v13 = vld [vmem:[#allocation2 + $0x6c] ss:$16 sps:$4 sm:$0xff]  }
  0x17   :  { %v4217_v14 = vld [vmem:[#allocation2 + $0x60] ss:$16 sps:$4 sm:$0xff]   ;;  %v4218_v15 = vld [vmem:[#allocation2 + $0x68] ss:$16 sps:$4 sm:$0xff]   ;;  %v4219_v16 = vld [vmem:[#allocation2 + $0x84] ss:$16 sps:$4 sm:$0xff]  }
  0x18   :  { %1980 = vmatpush1.bf16.msra.mxu0 %v4205_v6  ;;  %2432 = vmatpush1.bf16.msra.mxu1 %v4206_v7  ;;  %v4221_v17 = vld [vmem:[#allocation2 + $0x8c] ss:$16 sps:$4 sm:$0xff]   ;;  %v4223_v18 = vld [vmem:[#allocation2 + $0x80] ss:$16 sps:$4 sm:$0xff]   ;;  %v4224_v19 = vld [vmem:[#allocation2 + $0x88] ss:$16 sps:$4 sm:$0xff]  }
  0x19   :  { %1981 = vmatprep.subr.bf16.mxu0 %v4207_v8  ;;  %2433 = vmatprep.subr.bf16.mxu1 %v4209_v9  ;;  %v4225_v20 = vld [vmem:[#allocation2 + $0xa4] ss:$16 sps:$4 sm:$0xff]   ;;  %v4227_v21 = vld [vmem:[#allocation2 + $0xac] ss:$16 sps:$4 sm:$0xff]   ;;  %v4229_v22 = vld [vmem:[#allocation2 + $0xa0] ss:$16 sps:$4 sm:$0xff]  }
  0x1a   :  { %v4230_v23 = vld [vmem:[#allocation2 + $0xa8] ss:$16 sps:$4 sm:$0xff]   ;;  %v4231_v24 = vld [vmem:[#allocation2 + $0xc4] ss:$16 sps:$4 sm:$0xff]   ;;  %v4233_v25 = vld [vmem:[#allocation2 + $0xcc] ss:$16 sps:$4 sm:$0xff]  }
  0x1b   :  { %v4235_v26 = vld [vmem:[#allocation2 + $0xc0] ss:$16 sps:$4 sm:$0xff]   ;;  %v4236_v27 = vld [vmem:[#allocation2 + $0xc8] ss:$16 sps:$4 sm:$0xff]   ;;  %v4237_v28 = vld [vmem:[#allocation2 + $0xe4] ss:$16 sps:$4 sm:$0xff]  }
  0x1c   :  { %1982 = vmatpush1.bf16.msra.mxu0 %v4211_v10  ;;  %2434 = vmatpush1.bf16.msra.mxu1 %v4212_v11  ;;  %v4239_v29 = vld [vmem:[#allocation2 + $0xec] ss:$16 sps:$4 sm:$0xff]   ;;  %v4241_v30 = vld [vmem:[#allocation2 + $0xe0] ss:$16 sps:$4 sm:$0xff]   ;;  %v4242_v31 = vld [vmem:[#allocation2 + $0xe8] ss:$16 sps:$4 sm:$0xff]  }
  0x1d   :  { %1983 = vmatprep.subr.bf16.mxu0 %v4213_v12  ;;  %2435 = vmatprep.subr.bf16.mxu1 %v4215_v13  ;;  %v4243_v32 = vld [vmem:[#allocation2 + $0x104] ss:$16 sps:$4 sm:$0xff]   ;;  %v4245_v33 = vld [vmem:[#allocation2 + $0x10c] ss:$16 sps:$4 sm:$0xff]   ;;  %v4247_v34 = vld [vmem:[#allocation2 + $0x100] ss:$16 sps:$4 sm:$0xff]  }
  0x1e   :  { %v4248_v35 = vld [vmem:[#allocation2 + $0x108] ss:$16 sps:$4 sm:$0xff]   ;;  %v4249_v36 = vld [vmem:[#allocation2 + $0x124] ss:$16 sps:$4 sm:$0xff]   ;;  %v4251_v37 = vld [vmem:[#allocation2 + $0x12c] ss:$16 sps:$4 sm:$0xff]  }
  0x1f   :  { %v4253_v38 = vld [vmem:[#allocation2 + $0x120] ss:$16 sps:$4 sm:$0xff]   ;;  %v4254_v39 = vld [vmem:[#allocation2 + $0x128] ss:$16 sps:$4 sm:$0xff]   ;;  %v4255_v40 = vld [vmem:[#allocation2 + $0x144] ss:$16 sps:$4 sm:$0xff]  }
  0x20   :  { %1984 = vmatpush1.bf16.msra.mxu0 %v4217_v14  ;;  %2436 = vmatpush1.bf16.msra.mxu1 %v4218_v15  ;;  %v4257_v41 = vld [vmem:[#allocation2 + $0x14c] ss:$16 sps:$4 sm:$0xff]   ;;  %v4259_v42 = vld [vmem:[#allocation2 + $0x140] ss:$16 sps:$4 sm:$0xff]   ;;  %v4260_v43 = vld [vmem:[#allocation2 + $0x148] ss:$16 sps:$4 sm:$0xff]  }
  0x21   :  { %1985 = vmatprep.subr.bf16.mxu0 %v4219_v16  ;;  %2437 = vmatprep.subr.bf16.mxu1 %v4221_v17  ;;  %v4261_v44 = vld [vmem:[#allocation2 + $0x164] ss:$16 sps:$4 sm:$0xff]   ;;  %v4263_v45 = vld [vmem:[#allocation2 + $0x16c] ss:$16 sps:$4 sm:$0xff]   ;;  %v4265_v48 = vld [vmem:[#allocation2 + $0x160] ss:$16 sps:$4 sm:$0xff]  }
  0x22   :  { %v35_v46 = vld [vmem:[%s5112_s0] sm:$0xff]  ;;  %v4266_v49 = vld [vmem:[#allocation2 + $0x168] ss:$16 sps:$4 sm:$0xff]   ;;  %v4269_v52 = vld [vmem:[#allocation2 + $0x18c] ss:$16 sps:$4 sm:$0xff]  }
  0x23   :  { %v39_v47 = vld [vmem:[%s5112_s0 + $0x20] sm:$0xff]  ;;  %v4272_v54 = vld [vmem:[#allocation2 + $0x188] ss:$16 sps:$4 sm:$0xff]   ;;  %v4275_v56 = vld [vmem:[#allocation2 + $0x1ac] ss:$16 sps:$4 sm:$0xff]  }
  0x24   :  { %1986 = vmatpush1.bf16.msra.mxu0 %v4223_v18  ;;  %2438 = vmatpush1.bf16.msra.mxu1 %v4224_v19  ;;  %v3456_v50 = vcombine.high %v35_v46, %v39_v47  ;;  %v4267_v51 = vld [vmem:[#allocation2 + $0x184] ss:$16 sps:$4 sm:$0xff]   ;;  %v4271_v53 = vld [vmem:[#allocation2 + $0x180] ss:$16 sps:$4 sm:$0xff]   ;;  %v4278_v58 = vld [vmem:[#allocation2 + $0x1a8] ss:$16 sps:$4 sm:$0xff]   ;;  %v3455_v7 = vcombine.low %v35_v46, %v39_v47 }
  0x25   :  { %1987 = vmatprep.subr.bf16.mxu0 %v4225_v20  ;;  %2439 = vmatprep.subr.bf16.mxu1 %v4227_v21  ;;  %v4273_v55 = vld [vmem:[#allocation2 + $0x1a4] ss:$16 sps:$4 sm:$0xff]   ;;  %v4277_v57 = vld [vmem:[#allocation2 + $0x1a0] ss:$16 sps:$4 sm:$0xff]   ;;  %v4281_v60 = vld [vmem:[#allocation2 + $0x1cc] ss:$16 sps:$4 sm:$0xff]  }
  0x26   :  { %2009 = vmatprep.mubr.bf16.mxu0 %v3456_v50  ;;  %2461 = vmatprep.mubr.bf16.mxu1 %v3456_v50  ;;  %v4279_v59 = vld [vmem:[#allocation2 + $0x1c4] ss:$16 sps:$4 sm:$0xff]   ;;  %v4283_v61 = vld [vmem:[#allocation2 + $0x1c0] ss:$16 sps:$4 sm:$0xff]   ;;  %v4284_v62 = vld [vmem:[#allocation2 + $0x1c8] ss:$16 sps:$4 sm:$0xff]  }
  0x27   :  { %v4285_v63 = vld [vmem:[#allocation2 + $0x1e4] ss:$16 sps:$4 sm:$0xff]   ;;  %v4287_v0 = vld [vmem:[#allocation2 + $0x1ec] ss:$16 sps:$4 sm:$0xff]   ;;  %v4289_v1 = vld [vmem:[#allocation2 + $0x1e0] ss:$16 sps:$4 sm:$0xff]  }
  0x28   :  { %1988 = vmatpush1.bf16.msra.mxu0 %v4229_v22  ;;  %2440 = vmatpush1.bf16.msra.mxu1 %v4230_v23  ;;  %v4290_v2 = vld [vmem:[#allocation2 + $0x1e8] ss:$16 sps:$4 sm:$0xff]   ;;  %v4293_v3 = vld [vmem:[#allocation2 + $0x204] ss:$16 sps:$4 sm:$0xff]   ;;  %v4296_v4 = vld [vmem:[#allocation2 + $0x20c] ss:$16 sps:$4 sm:$0xff]  }
  0x29   :  { %1989 = vmatprep.subr.bf16.mxu0 %v4231_v24  ;;  %2441 = vmatprep.subr.bf16.mxu1 %v4233_v25  ;;  %v4291_v5 = vld [vmem:[#allocation2 + $0x200] ss:$16 sps:$4 sm:$0xff]   ;;  %v4294_v6 = vld [vmem:[#allocation2 + $0x208] ss:$16 sps:$4 sm:$0xff]   ;;  %v4299_v10 = vld [vmem:[#allocation2 + $0x224] ss:$16 sps:$4 sm:$0xff]  }
  0x2a   :  { %v43_v8 = vld [vmem:[%s5112_s0 + $0x40] sm:$0xff]  ;;  %v4302_v11 = vld [vmem:[#allocation2 + $0x22c] ss:$16 sps:$4 sm:$0xff]   ;;  %v4300_v14 = vld [vmem:[#allocation2 + $0x228] ss:$16 sps:$4 sm:$0xff]  }
  0x2b   :  { %v47_v9 = vld [vmem:[%s5112_s0 + $0x60] sm:$0xff]  ;;  %v4308_v16 = vld [vmem:[#allocation2 + $0x24c] ss:$16 sps:$4 sm:$0xff]   ;;  %v4306_v21 = vld [vmem:[#allocation2 + $0x248] ss:$16 sps:$4 sm:$0xff]  }
  0x2c   :  { %1990 = vmatpush1.bf16.msra.mxu0 %v4235_v26  ;;  %2442 = vmatpush1.bf16.msra.mxu1 %v4236_v27  ;;  %v3464_v12 = vcombine.high %v43_v8, %v47_v9  ;;  %v4297_v13 = vld [vmem:[#allocation2 + $0x220] ss:$16 sps:$4 sm:$0xff]   ;;  %v4305_v15 = vld [vmem:[#allocation2 + $0x244] ss:$16 sps:$4 sm:$0xff]   ;;  %v3463_v18 = vcombine.low %v43_v8, %v47_v9  ;;  %v4314_v23 = vld [vmem:[#allocation2 + $0x26c] ss:$16 sps:$4 sm:$0xff]  }
  0x2d   :  { %1991 = vmatprep.subr.bf16.mxu0 %v4237_v28  ;;  %2443 = vmatprep.subr.bf16.mxu1 %v4239_v29  ;;  %v51_v17 = vld [vmem:[%s5112_s0 + $0x80] sm:$0xff]  ;;  %v4312_v26 = vld [vmem:[#allocation2 + $0x268] ss:$16 sps:$4 sm:$0xff]   ;;  %v4320_v28 = vld [vmem:[#allocation2 + $0x28c] ss:$16 sps:$4 sm:$0xff]  }
  0x2e   :  { %v55_v19 = vld [vmem:[%s5112_s0 + $0xa0] sm:$0xff]  ;;  %v4338_v47 = vld [vmem:[#allocation2 + $0x2ec] ss:$16 sps:$4 sm:$0xff]   ;;  %v4336_v50 = vld [vmem:[#allocation2 + $0x2e8] ss:$16 sps:$4 sm:$0xff]  }
  0x2f   :  { %v4303_v20 = vld [vmem:[#allocation2 + $0x240] ss:$16 sps:$4 sm:$0xff]   ;;  %v4311_v22 = vld [vmem:[#allocation2 + $0x264] ss:$16 sps:$4 sm:$0xff]   ;;  %v3472_v24 = vcombine.high %v51_v17, %v55_v19 }
  0x30   :  { %1992 = vmatpush1.bf16.msra.mxu0 %v4241_v30  ;;  %2444 = vmatpush1.bf16.msra.mxu1 %v4242_v31  ;;  %v4309_v25 = vld [vmem:[#allocation2 + $0x260] ss:$16 sps:$4 sm:$0xff]   ;;  %v4317_v27 = vld [vmem:[#allocation2 + $0x284] ss:$16 sps:$4 sm:$0xff]   ;;  %v3471_v30 = vcombine.low %v51_v17, %v55_v19  ;;  %v4374_v19 = vld [vmem:[#allocation2 + $0x3ac] ss:$16 sps:$4 sm:$0xff]  }
  0x31   :  { %1993 = vmatprep.subr.bf16.mxu0 %v4243_v32  ;;  %2445 = vmatprep.subr.bf16.mxu1 %v4245_v33  ;;  %v59_v29 = vld [vmem:[%s5112_s0 + $0xc0] sm:$0xff]  ;;  %v4318_v33 = vld [vmem:[#allocation2 + $0x288] ss:$16 sps:$4 sm:$0xff]  }
  0x32   :  { %v63_v31 = vld [vmem:[%s5112_s0 + $0xe0] sm:$0xff] }
  0x33   :  { %v4315_v32 = vld [vmem:[#allocation2 + $0x280] ss:$16 sps:$4 sm:$0xff]   ;;  %v4335_v46 = vld [vmem:[#allocation2 + $0x2e4] ss:$16 sps:$4 sm:$0xff]  }
  0x34   :  { %1994 = vmatpush1.bf16.msra.mxu0 %v4247_v34  ;;  %2446 = vmatpush1.bf16.msra.mxu1 %v4248_v35  ;;  %v4323_v34 = vld [vmem:[#allocation2 + $0x2a4] ss:$16 sps:$4 sm:$0xff]   ;;  %v4326_v35 = vld [vmem:[#allocation2 + $0x2ac] ss:$16 sps:$4 sm:$0xff]   ;;  %v4357_v9 = vld [vmem:[#allocation2 + $0x360] ss:$16 sps:$4 sm:$0xff]  }
  0x35   :  { %1995 = vmatprep.subr.bf16.mxu0 %v4249_v36  ;;  %2447 = vmatprep.subr.bf16.mxu1 %v4251_v37  ;;  %v3480_v36 = vcombine.high %v59_v29, %v63_v31  ;;  %v4321_v37 = vld [vmem:[#allocation2 + $0x2a0] ss:$16 sps:$4 sm:$0xff]  }
  0x36   :  { %v95_v17 = vld [vmem:[%s5112_s0 + $0x1e0] sm:$0xff] }
  0x38   :  { %1996 = vmatpush1.bf16.msra.mxu0 %v4253_v38  ;;  %2448 = vmatpush1.bf16.msra.mxu1 %v4254_v39  ;;  %v4324_v38 = vld [vmem:[#allocation2 + $0x2a8] ss:$16 sps:$4 sm:$0xff]   ;;  %v4329_v39 = vld [vmem:[#allocation2 + $0x2c4] ss:$16 sps:$4 sm:$0xff]  }
  0x39   :  { %1997 = vmatprep.subr.bf16.mxu0 %v4255_v40  ;;  %2449 = vmatprep.subr.bf16.mxu1 %v4257_v41  ;;  %v4332_v40 = vld [vmem:[#allocation2 + $0x2cc] ss:$16 sps:$4 sm:$0xff]   ;;  %v4327_v41 = vld [vmem:[#allocation2 + $0x2c0] ss:$16 sps:$4 sm:$0xff]  }
  0x3c   :  { %1998 = vmatpush1.bf16.msra.mxu0 %v4259_v42  ;;  %2450 = vmatpush1.bf16.msra.mxu1 %v4260_v43  ;;  %v4330_v42 = vld [vmem:[#allocation2 + $0x2c8] ss:$16 sps:$4 sm:$0xff]   ;;  %v3479_v43 = vcombine.low %v59_v29, %v63_v31  ;;  %v4386_v31 = vld [vmem:[#allocation2 + $0x3ec] ss:$16 sps:$4 sm:$0xff]  }
  0x3d   :  { %1999 = vmatprep.subr.bf16.mxu0 %v4261_v44  ;;  %2451 = vmatprep.subr.bf16.mxu1 %v4263_v45  ;;  %v67_v44 = vld [vmem:[%s5112_s0 + $0x100] sm:$0xff]  ;;  %v4378_v29 = vld [vmem:[#allocation2 + $0x3c8] ss:$16 sps:$4 sm:$0xff]  }
  0x3e   :  { %v71_v45 = vld [vmem:[%s5112_s0 + $0x120] sm:$0xff] }
  0x40   :  { %2000 = vmatpush1.bf16.msra.mxu0 %v4265_v48  ;;  %2452 = vmatpush1.bf16.msra.mxu1 %v4266_v49  ;;  %v3488_v48 = vcombine.high %v67_v44, %v71_v45  ;;  %v4333_v49 = vld [vmem:[#allocation2 + $0x2e0] ss:$16 sps:$4 sm:$0xff]  }
  0x41   :  { %2001 = vmatprep.subr.bf16.mxu0 %v4267_v51  ;;  %2453 = vmatprep.subr.bf16.mxu1 %v4269_v52  ;;  %v4341_v51 = vld [vmem:[#allocation2 + $0x304] ss:$16 sps:$4 sm:$0xff]   ;;  %v4344_v52 = vld [vmem:[#allocation2 + $0x30c] ss:$16 sps:$4 sm:$0xff]  }
  0x44   :  { %2002 = vmatpush1.bf16.msra.mxu0 %v4271_v53  ;;  %2454 = vmatpush1.bf16.msra.mxu1 %v4272_v54  ;;  %v75_v53 = vld [vmem:[%s5112_s0 + $0x140] sm:$0xff]  ;;  %v3487_v54 = vcombine.low %v67_v44, %v71_v45 }
  0x45   :  { %2003 = vmatprep.subr.bf16.mxu0 %v4273_v55  ;;  %2455 = vmatprep.subr.bf16.mxu1 %v4275_v56  ;;  %v79_v55 = vld [vmem:[%s5112_s0 + $0x160] sm:$0xff] }
  0x46   :  { %v4339_v56 = vld [vmem:[#allocation2 + $0x300] ss:$16 sps:$4 sm:$0xff]  }
  0x47   :  { %v4393_v45 = vld [vmem:[#allocation2 + $0x420] ss:$16 sps:$4 sm:$0xff]  }
  0x48   :  { %2004 = vmatpush1.bf16.msra.mxu0 %v4277_v57  ;;  %2456 = vmatpush1.bf16.msra.mxu1 %v4278_v58  ;;  %v4342_v57 = vld [vmem:[#allocation2 + $0x308] ss:$16 sps:$4 sm:$0xff]   ;;  %v4347_v58 = vld [vmem:[#allocation2 + $0x324] ss:$16 sps:$4 sm:$0xff]  }
  0x49   :  { %2005 = vmatprep.subr.bf16.mxu0 %v4279_v59  ;;  %2457 = vmatprep.subr.bf16.mxu1 %v4281_v60  ;;  %v4350_v59 = vld [vmem:[#allocation2 + $0x32c] ss:$16 sps:$4 sm:$0xff]   ;;  %v3496_v60 = vcombine.high %v75_v53, %v79_v55 }
  0x4c   :  { %2006 = vmatpush1.bf16.msra.mxu0 %v4283_v61  ;;  %2458 = vmatpush1.bf16.msra.mxu1 %v4284_v62  ;;  %v4345_v61 = vld [vmem:[#allocation2 + $0x320] ss:$16 sps:$4 sm:$0xff]   ;;  %v4348_v62 = vld [vmem:[#allocation2 + $0x328] ss:$16 sps:$4 sm:$0xff]  }
  0x4d   :  { %2007 = vmatprep.subr.bf16.mxu0 %v4285_v63  ;;  %2459 = vmatprep.subr.bf16.mxu1 %v4287_v0  ;;  %v4353_v63 = vld [vmem:[#allocation2 + $0x344] ss:$16 sps:$4 sm:$0xff]   ;;  %v4356_v0 = vld [vmem:[#allocation2 + $0x34c] ss:$16 sps:$4 sm:$0xff]  }
  0x50   :  { %2008 = vmatpush1.bf16.msra.mxu0 %v4289_v1  ;;  %2460 = vmatpush1.bf16.msra.mxu1 %v4290_v2  ;;  %v83_v1 = vld [vmem:[%s5112_s0 + $0x180] sm:$0xff]  ;;  %v3495_v2 = vcombine.low %v75_v53, %v79_v55  ;;  %v56_v53 = vld [vmem:[%s5112_s0 + $0xa8] sm:$0xff] }
  0x51   :  { %2090 = vmatprep.subr.bf16.mxu0 %v4293_v3  ;;  %2542 = vmatprep.subr.bf16.mxu1 %v4296_v4  ;;  %v87_v3 = vld [vmem:[%s5112_s0 + $0x1a0] sm:$0xff]  ;;  %v4410_v55 = vld [vmem:[#allocation2 + $0x46c] ss:$16 sps:$4 sm:$0xff]  }
  0x52   :  { %v4351_v4 = vld [vmem:[#allocation2 + $0x340] ss:$16 sps:$4 sm:$0xff]   ;;  %v3504_v8 = vcombine.high %v83_v1, %v87_v3 }
  0x53   :  { %2010 = vmatmul.mubr.bf16.vlgmr.msra.gmra.mrb[0].mxu0 %v3455_v7  ;;  %2462 = vmatmul.mubr.bf16.vlgmr.msra.gmra.mrb[0].mxu1 %v3455_v7  ;;  %v4362_v7 = vld [vmem:[#allocation2 + $0x36c] ss:$16 sps:$4 sm:$0xff]  }
  0x54   :  { %2091 = vmatpush1.bf16.msra.mxu0 %v4291_v5  ;;  %2543 = vmatpush1.bf16.msra.mxu1 %v4294_v6  ;;  %v4354_v5 = vld [vmem:[#allocation2 + $0x348] ss:$16 sps:$4 sm:$0xff]   ;;  %v4359_v6 = vld [vmem:[#allocation2 + $0x364] ss:$16 sps:$4 sm:$0xff]  }
  0x55   :  { %2092 = vmatprep.subr.bf16.mxu0 %v4299_v10  ;;  %2544 = vmatprep.subr.bf16.mxu1 %v4302_v11  ;;  %v4360_v10 = vld [vmem:[#allocation2 + $0x368] ss:$16 sps:$4 sm:$0xff]   ;;  %v4365_v11 = vld [vmem:[#allocation2 + $0x384] ss:$16 sps:$4 sm:$0xff]  }
  0x56   :  { %2019 = vmatprep.mubr.bf16.mxu0 %v3464_v12  ;;  %2471 = vmatprep.mubr.bf16.mxu1 %v3464_v12  ;;  %v4368_v12 = vld [vmem:[#allocation2 + $0x38c] ss:$16 sps:$4 sm:$0xff]  }
  0x58   :  { %2093 = vmatpush1.bf16.msra.mxu0 %v4297_v13  ;;  %2545 = vmatpush1.bf16.msra.mxu1 %v4300_v14  ;;  %v4363_v13 = vld [vmem:[#allocation2 + $0x380] ss:$16 sps:$4 sm:$0xff]   ;;  %v4366_v14 = vld [vmem:[#allocation2 + $0x388] ss:$16 sps:$4 sm:$0xff]  }
  0x59   :  { %2094 = vmatprep.subr.bf16.mxu0 %v4305_v15  ;;  %2546 = vmatprep.subr.bf16.mxu1 %v4308_v16  ;;  %v3503_v15 = vcombine.low %v83_v1, %v87_v3  ;;  %v91_v16 = vld [vmem:[%s5112_s0 + $0x1c0] sm:$0xff]  ;;  %v4414_v1 = vld [vmem:[#allocation2 + $0x488] ss:$16 sps:$4 sm:$0xff]   ;;  %v4422_v3 = vld [vmem:[#allocation2 + $0x4ac] ss:$16 sps:$4 sm:$0xff]  }
  0x5b   :  { %2020 = vmatmul.mubr.bf16.gmra.mrb[4].mxu0 %v3463_v18  ;;  %2472 = vmatmul.mubr.bf16.gmra.mrb[4].mxu1 %v3463_v18  ;;  %v4371_v18 = vld [vmem:[#allocation2 + $0x3a4] ss:$16 sps:$4 sm:$0xff]  }
  0x5c   :  { %2095 = vmatpush1.bf16.msra.mxu0 %v4303_v20  ;;  %2547 = vmatpush1.bf16.msra.mxu1 %v4306_v21  ;;  %v3512_v20 = vcombine.high %v91_v16, %v95_v17  ;;  %v4369_v21 = vld [vmem:[#allocation2 + $0x3a0] ss:$16 sps:$4 sm:$0xff]  }
  0x5d   :  { %2096 = vmatprep.subr.bf16.mxu0 %v4311_v22  ;;  %2548 = vmatprep.subr.bf16.mxu1 %v4314_v23  ;;  %v4372_v22 = vld [vmem:[#allocation2 + $0x3a8] ss:$16 sps:$4 sm:$0xff]   ;;  %v4377_v23 = vld [vmem:[#allocation2 + $0x3c4] ss:$16 sps:$4 sm:$0xff]  }
  0x5e   :  { %2029 = vmatprep.mubr.bf16.mxu0 %v3472_v24  ;;  %2481 = vmatprep.mubr.bf16.mxu1 %v3472_v24  ;;  %v4380_v24 = vld [vmem:[#allocation2 + $0x3cc] ss:$16 sps:$4 sm:$0xff]  }
  0x60   :  { %2097 = vmatpush1.bf16.msra.mxu0 %v4309_v25  ;;  %2549 = vmatpush1.bf16.msra.mxu1 %v4312_v26  ;;  %v36_v25 = vld [vmem:[%s5112_s0 + $0x8] sm:$0xff]  ;;  %v3511_v26 = vcombine.low %v91_v16, %v95_v17  ;;  %v4429_v17 = vld [vmem:[#allocation2 + $0x4e0] ss:$16 sps:$4 sm:$0xff]  }
  0x61   :  { %2098 = vmatprep.subr.bf16.mxu0 %v4317_v27  ;;  %2550 = vmatprep.subr.bf16.mxu1 %v4320_v28  ;;  %v40_v27 = vld [vmem:[%s5112_s0 + $0x28] sm:$0xff]  ;;  %v4375_v28 = vld [vmem:[#allocation2 + $0x3c0] ss:$16 sps:$4 sm:$0xff]  }
  0x63   :  { %2030 = vmatmul.mubr.bf16.gmra.mrb[8].mxu0 %v3471_v30  ;;  %2482 = vmatmul.mubr.bf16.gmra.mrb[8].mxu1 %v3471_v30  ;;  %v4383_v30 = vld [vmem:[#allocation2 + $0x3e4] ss:$16 sps:$4 sm:$0xff]  }
  0x64   :  { %2099 = vmatpush1.bf16.msra.mxu0 %v4315_v32  ;;  %2551 = vmatpush1.bf16.msra.mxu1 %v4318_v33  ;;  %v3458_v32 = vcombine.high %v36_v25, %v40_v27  ;;  %v4381_v33 = vld [vmem:[#allocation2 + $0x3e0] ss:$16 sps:$4 sm:$0xff]  }
  0x65   :  { %2100 = vmatprep.subr.bf16.mxu0 %v4323_v34  ;;  %2552 = vmatprep.subr.bf16.mxu1 %v4326_v35  ;;  %v4384_v34 = vld [vmem:[#allocation2 + $0x3e8] ss:$16 sps:$4 sm:$0xff]   ;;  %v4389_v35 = vld [vmem:[#allocation2 + $0x404] ss:$16 sps:$4 sm:$0xff]  }
  0x66   :  { %2039 = vmatprep.mubr.bf16.mxu0 %v3480_v36  ;;  %2491 = vmatprep.mubr.bf16.mxu1 %v3480_v36  ;;  %v4392_v36 = vld [vmem:[#allocation2 + $0x40c] ss:$16 sps:$4 sm:$0xff]  }
  0x68   :  { %2101 = vmatpush1.bf16.msra.mxu0 %v4321_v37  ;;  %2553 = vmatpush1.bf16.msra.mxu1 %v4324_v38  ;;  %v44_v37 = vld [vmem:[%s5112_s0 + $0x48] sm:$0xff]  ;;  %v3457_v38 = vcombine.low %v36_v25, %v40_v27 }
  0x69   :  { %2102 = vmatprep.subr.bf16.mxu0 %v4329_v39  ;;  %2554 = vmatprep.subr.bf16.mxu1 %v4332_v40  ;;  %v48_v39 = vld [vmem:[%s5112_s0 + $0x68] sm:$0xff]  ;;  %v4387_v40 = vld [vmem:[#allocation2 + $0x400] ss:$16 sps:$4 sm:$0xff]  }
  0x6a   :  { %v3466_v44 = vcombine.high %v44_v37, %v48_v39  ;;  %v80_v25 = vld [vmem:[%s5112_s0 + $0x168] sm:$0xff] }
  0x6b   :  { %2040 = vmatmul.mubr.bf16.gmra.mrb[12].mxu0 %v3479_v43  ;;  %2492 = vmatmul.mubr.bf16.gmra.mrb[12].mxu1 %v3479_v43  ;;  %v4398_v43 = vld [vmem:[#allocation2 + $0x42c] ss:$16 sps:$4 sm:$0xff]  }
  0x6c   :  { %2103 = vmatpush1.bf16.msra.mxu0 %v4327_v41  ;;  %2555 = vmatpush1.bf16.msra.mxu1 %v4330_v42  ;;  %v4390_v41 = vld [vmem:[#allocation2 + $0x408] ss:$16 sps:$4 sm:$0xff]   ;;  %v4395_v42 = vld [vmem:[#allocation2 + $0x424] ss:$16 sps:$4 sm:$0xff]   ;;  %v4446_v27 = vld [vmem:[#allocation2 + $0x52c] ss:$16 sps:$4 sm:$0xff]  }
  0x6d   :  { %2104 = vmatprep.subr.bf16.mxu0 %v4335_v46  ;;  %2556 = vmatprep.subr.bf16.mxu1 %v4338_v47  ;;  %v4396_v46 = vld [vmem:[#allocation2 + $0x428] ss:$16 sps:$4 sm:$0xff]   ;;  %v4401_v47 = vld [vmem:[#allocation2 + $0x444] ss:$16 sps:$4 sm:$0xff]  }
  0x6e   :  { %2049 = vmatprep.mubr.bf16.mxu0 %v3488_v48  ;;  %2501 = vmatprep.mubr.bf16.mxu1 %v3488_v48  ;;  %v4404_v48 = vld [vmem:[#allocation2 + $0x44c] ss:$16 sps:$4 sm:$0xff]  }
  0x70   :  { %2105 = vmatpush1.bf16.msra.mxu0 %v4333_v49  ;;  %2557 = vmatpush1.bf16.msra.mxu1 %v4336_v50  ;;  %v4399_v49 = vld [vmem:[#allocation2 + $0x440] ss:$16 sps:$4 sm:$0xff]   ;;  %v4402_v50 = vld [vmem:[#allocation2 + $0x448] ss:$16 sps:$4 sm:$0xff]  }
  0x71   :  { %2106 = vmatprep.subr.bf16.mxu0 %v4341_v51  ;;  %2558 = vmatprep.subr.bf16.mxu1 %v4344_v52  ;;  %v3465_v51 = vcombine.low %v44_v37, %v48_v39  ;;  %v52_v52 = vld [vmem:[%s5112_s0 + $0x88] sm:$0xff] }
  0x72   :  { %v4450_v37 = vld [vmem:[#allocation2 + $0x548] ss:$16 sps:$4 sm:$0xff]   ;;  %v4458_v39 = vld [vmem:[#allocation2 + $0x56c] ss:$16 sps:$4 sm:$0xff]  }
  0x73   :  { %2050 = vmatmul.mubr.bf16.gmra.mrb[16].mxu0 %v3487_v54  ;;  %2502 = vmatmul.mubr.bf16.gmra.mrb[16].mxu1 %v3487_v54  ;;  %v4407_v54 = vld [vmem:[#allocation2 + $0x464] ss:$16 sps:$4 sm:$0xff]  }
  0x74   :  { %2107 = vmatpush1.bf16.msra.mxu0 %v4339_v56  ;;  %2559 = vmatpush1.bf16.msra.mxu1 %v4342_v57  ;;  %v3474_v56 = vcombine.high %v52_v52, %v56_v53  ;;  %v4405_v57 = vld [vmem:[#allocation2 + $0x460] ss:$16 sps:$4 sm:$0xff]  }
  0x75   :  { %2108 = vmatprep.subr.bf16.mxu0 %v4347_v58  ;;  %2560 = vmatprep.subr.bf16.mxu1 %v4350_v59  ;;  %v4408_v58 = vld [vmem:[#allocation2 + $0x468] ss:$16 sps:$4 sm:$0xff]   ;;  %v4413_v59 = vld [vmem:[#allocation2 + $0x484] ss:$16 sps:$4 sm:$0xff]  }
  0x76   :  { %2059 = vmatprep.mubr.bf16.mxu0 %v3496_v60  ;;  %2511 = vmatprep.mubr.bf16.mxu1 %v3496_v60  ;;  %v4416_v60 = vld [vmem:[#allocation2 + $0x48c] ss:$16 sps:$4 sm:$0xff]  }
  0x78   :  { %2109 = vmatpush1.bf16.msra.mxu0 %v4345_v61  ;;  %2561 = vmatpush1.bf16.msra.mxu1 %v4348_v62  ;;  %v60_v61 = vld [vmem:[%s5112_s0 + $0xc8] sm:$0xff]  ;;  %v3473_v62 = vcombine.low %v52_v52, %v56_v53  ;;  %v4465_v53 = vld [vmem:[#allocation2 + $0x5a0] ss:$16 sps:$4 sm:$0xff]  }
  0x79   :  { %2110 = vmatprep.subr.bf16.mxu0 %v4353_v63  ;;  %2562 = vmatprep.subr.bf16.mxu1 %v4356_v0  ;;  %v64_v63 = vld [vmem:[%s5112_s0 + $0xe8] sm:$0xff]  ;;  %v4411_v0 = vld [vmem:[#allocation2 + $0x480] ss:$16 sps:$4 sm:$0xff]  }
  0x7b   :  { %2060 = vmatmul.mubr.bf16.gmra.mrb[20].mxu0 %v3495_v2  ;;  %2512 = vmatmul.mubr.bf16.gmra.mrb[20].mxu1 %v3495_v2  ;;  %v4419_v2 = vld [vmem:[#allocation2 + $0x4a4] ss:$16 sps:$4 sm:$0xff]  }
  0x7c   :  { %2111 = vmatpush1.bf16.msra.mxu0 %v4351_v4  ;;  %2563 = vmatpush1.bf16.msra.mxu1 %v4354_v5  ;;  %v3482_v4 = vcombine.high %v60_v61, %v64_v63  ;;  %v4417_v5 = vld [vmem:[#allocation2 + $0x4a0] ss:$16 sps:$4 sm:$0xff]  }
  0x7d   :  { %2112 = vmatprep.subr.bf16.mxu0 %v4359_v6  ;;  %2564 = vmatprep.subr.bf16.mxu1 %v4362_v7  ;;  %v4420_v6 = vld [vmem:[#allocation2 + $0x4a8] ss:$16 sps:$4 sm:$0xff]   ;;  %v4425_v7 = vld [vmem:[#allocation2 + $0x4c4] ss:$16 sps:$4 sm:$0xff]  }
  0x7e   :  { %2069 = vmatprep.mubr.bf16.mxu0 %v3504_v8  ;;  %2521 = vmatprep.mubr.bf16.mxu1 %v3504_v8  ;;  %v4428_v8 = vld [vmem:[#allocation2 + $0x4cc] ss:$16 sps:$4 sm:$0xff]  }
  0x80   :  { %2113 = vmatpush1.bf16.msra.mxu0 %v4357_v9  ;;  %2565 = vmatpush1.bf16.msra.mxu1 %v4360_v10  ;;  %v68_v9 = vld [vmem:[%s5112_s0 + $0x108] sm:$0xff]  ;;  %v3481_v10 = vcombine.low %v60_v61, %v64_v63  ;;  %v41_v61 = vld [vmem:[%s5112_s0 + $0x30] sm:$0xff] }
  0x81   :  { %2114 = vmatprep.subr.bf16.mxu0 %v4365_v11  ;;  %2566 = vmatprep.subr.bf16.mxu1 %v4368_v12  ;;  %v72_v11 = vld [vmem:[%s5112_s0 + $0x128] sm:$0xff]  ;;  %v4423_v12 = vld [vmem:[#allocation2 + $0x4c0] ss:$16 sps:$4 sm:$0xff]  }
  0x82   :  { %v3490_v16 = vcombine.high %v68_v9, %v72_v11  ;;  %v4482_v63 = vld [vmem:[#allocation2 + $0x5ec] ss:$16 sps:$4 sm:$0xff]  }
  0x83   :  { %2070 = vmatmul.mubr.bf16.gmra.mrb[24].mxu0 %v3503_v15  ;;  %2522 = vmatmul.mubr.bf16.gmra.mrb[24].mxu1 %v3503_v15  ;;  %v4434_v15 = vld [vmem:[#allocation2 + $0x4ec] ss:$16 sps:$4 sm:$0xff]  }
  0x84   :  { %2115 = vmatpush1.bf16.msra.mxu0 %v4363_v13  ;;  %2567 = vmatpush1.bf16.msra.mxu1 %v4366_v14  ;;  %v4426_v13 = vld [vmem:[#allocation2 + $0x4c8] ss:$16 sps:$4 sm:$0xff]   ;;  %v4431_v14 = vld [vmem:[#allocation2 + $0x4e4] ss:$16 sps:$4 sm:$0xff]  }
  0x85   :  { %2116 = vmatprep.subr.bf16.mxu0 %v4371_v18  ;;  %2568 = vmatprep.subr.bf16.mxu1 %v4374_v19  ;;  %v4432_v18 = vld [vmem:[#allocation2 + $0x4e8] ss:$16 sps:$4 sm:$0xff]   ;;  %v4437_v19 = vld [vmem:[#allocation2 + $0x504] ss:$16 sps:$4 sm:$0xff]  }
  0x86   :  { %2079 = vmatprep.mubr.bf16.mxu0 %v3512_v20  ;;  %2531 = vmatprep.mubr.bf16.mxu1 %v3512_v20  ;;  %v4440_v20 = vld [vmem:[#allocation2 + $0x50c] ss:$16 sps:$4 sm:$0xff]  }
  0x88   :  { %2117 = vmatpush1.bf16.msra.mxu0 %v4369_v21  ;;  %2569 = vmatpush1.bf16.msra.mxu1 %v4372_v22  ;;  %v4435_v21 = vld [vmem:[#allocation2 + $0x500] ss:$16 sps:$4 sm:$0xff]   ;;  %v4438_v22 = vld [vmem:[#allocation2 + $0x508] ss:$16 sps:$4 sm:$0xff]  }
  0x89   :  { %2118 = vmatprep.subr.bf16.mxu0 %v4377_v23  ;;  %2570 = vmatprep.subr.bf16.mxu1 %v4380_v24  ;;  %v3489_v23 = vcombine.low %v68_v9, %v72_v11  ;;  %v76_v24 = vld [vmem:[%s5112_s0 + $0x148] sm:$0xff]  ;;  %v49_v9 = vld [vmem:[%s5112_s0 + $0x70] sm:$0xff] }
  0x8a   :  { %v4494_v11 = vld [vmem:[#allocation2 + $0x62c] ss:$16 sps:$4 sm:$0xff]  }
  0x8b   :  { %2080 = vmatmul.mubr.bf16.gmra.mrb[28].mxu0 %v3511_v26  ;;  %2532 = vmatmul.mubr.bf16.gmra.mrb[28].mxu1 %v3511_v26  ;;  %v4443_v26 = vld [vmem:[#allocation2 + $0x524] ss:$16 sps:$4 sm:$0xff]  }
  0x8c   :  { %2119 = vmatpush1.bf16.msra.mxu0 %v4375_v28  ;;  %2571 = vmatpush1.bf16.msra.mxu1 %v4378_v29  ;;  %v3498_v28 = vcombine.high %v76_v24, %v80_v25  ;;  %v4441_v29 = vld [vmem:[#allocation2 + $0x520] ss:$16 sps:$4 sm:$0xff]  }
  0x8d   :  { %2120 = vmatprep.subr.bf16.mxu0 %v4383_v30  ;;  %2572 = vmatprep.subr.bf16.mxu1 %v4386_v31  ;;  %v4444_v30 = vld [vmem:[#allocation2 + $0x528] ss:$16 sps:$4 sm:$0xff]   ;;  %v4449_v31 = vld [vmem:[#allocation2 + $0x544] ss:$16 sps:$4 sm:$0xff]  }
  0x8e   :  { %2122 = vmatprep.mubr.bf16.mxu0 %v3458_v32  ;;  %2574 = vmatprep.mubr.bf16.mxu1 %v3458_v32  ;;  %v4452_v32 = vld [vmem:[#allocation2 + $0x54c] ss:$16 sps:$4 sm:$0xff]  }
  0x90   :  { %2121 = vmatpush1.bf16.msra.mxu0 %v4381_v33  ;;  %2573 = vmatpush1.bf16.msra.mxu1 %v4384_v34  ;;  %v84_v33 = vld [vmem:[%s5112_s0 + $0x188] sm:$0xff]  ;;  %v3497_v34 = vcombine.low %v76_v24, %v80_v25  ;;  %v4501_v24 = vld [vmem:[#allocation2 + $0x660] ss:$16 sps:$4 sm:$0xff]  }
  0x91   :  { %2203 = vmatprep.subr.bf16.mxu0 %v4389_v35  ;;  %2655 = vmatprep.subr.bf16.mxu1 %v4392_v36  ;;  %v88_v35 = vld [vmem:[%s5112_s0 + $0x1a8] sm:$0xff]  ;;  %v4447_v36 = vld [vmem:[#allocation2 + $0x540] ss:$16 sps:$4 sm:$0xff]  }
  0x93   :  { %2123 = vmatmul.mubr.bf16.vlgmr.msra.gmra.mrb[0].mxu0 %v3457_v38  ;;  %2575 = vmatmul.mubr.bf16.vlgmr.msra.gmra.mrb[0].mxu1 %v3457_v38  ;;  %v4455_v38 = vld [vmem:[#allocation2 + $0x564] ss:$16 sps:$4 sm:$0xff]  }
  0x94   :  { %2204 = vmatpush1.bf16.msra.mxu0 %v4387_v40  ;;  %2656 = vmatpush1.bf16.msra.mxu1 %v4390_v41  ;;  %v3506_v40 = vcombine.high %v84_v33, %v88_v35  ;;  %v4453_v41 = vld [vmem:[#allocation2 + $0x560] ss:$16 sps:$4 sm:$0xff]  }
  0x95   :  { %2205 = vmatprep.subr.bf16.mxu0 %v4395_v42  ;;  %2657 = vmatprep.subr.bf16.mxu1 %v4398_v43  ;;  %v4456_v42 = vld [vmem:[#allocation2 + $0x568] ss:$16 sps:$4 sm:$0xff]   ;;  %v4461_v43 = vld [vmem:[#allocation2 + $0x584] ss:$16 sps:$4 sm:$0xff]  }
  0x96   :  { %2132 = vmatprep.mubr.bf16.mxu0 %v3466_v44  ;;  %2584 = vmatprep.mubr.bf16.mxu1 %v3466_v44  ;;  %v4464_v44 = vld [vmem:[#allocation2 + $0x58c] ss:$16 sps:$4 sm:$0xff]  }
  0x98   :  { %2206 = vmatpush1.bf16.msra.mxu0 %v4393_v45  ;;  %2658 = vmatpush1.bf16.msra.mxu1 %v4396_v46  ;;  %v92_v45 = vld [vmem:[%s5112_s0 + $0x1c8] sm:$0xff]  ;;  %v3505_v46 = vcombine.low %v84_v33, %v88_v35  ;;  %v65_v33 = vld [vmem:[%s5112_s0 + $0xf0] sm:$0xff] }
  0x99   :  { %2207 = vmatprep.subr.bf16.mxu0 %v4401_v47  ;;  %2659 = vmatprep.subr.bf16.mxu1 %v4404_v48  ;;  %v96_v47 = vld [vmem:[%s5112_s0 + $0x1e8] sm:$0xff]  ;;  %v4459_v48 = vld [vmem:[#allocation2 + $0x580] ss:$16 sps:$4 sm:$0xff]  }
  0x9a   :  { %v3514_v52 = vcombine.high %v92_v45, %v96_v47  ;;  %v4518_v35 = vld [vmem:[#allocation2 + $0x6ac] ss:$16 sps:$4 sm:$0xff]  }
  0x9b   :  { %2133 = vmatmul.mubr.bf16.gmra.mrb[4].mxu0 %v3465_v51  ;;  %2585 = vmatmul.mubr.bf16.gmra.mrb[4].mxu1 %v3465_v51  ;;  %v4470_v51 = vld [vmem:[#allocation2 + $0x5ac] ss:$16 sps:$4 sm:$0xff]  }
  0x9c   :  { %2208 = vmatpush1.bf16.msra.mxu0 %v4399_v49  ;;  %2660 = vmatpush1.bf16.msra.mxu1 %v4402_v50  ;;  %v4462_v49 = vld [vmem:[#allocation2 + $0x588] ss:$16 sps:$4 sm:$0xff]   ;;  %v4467_v50 = vld [vmem:[#allocation2 + $0x5a4] ss:$16 sps:$4 sm:$0xff]  }
  0x9d   :  { %2209 = vmatprep.subr.bf16.mxu0 %v4407_v54  ;;  %2661 = vmatprep.subr.bf16.mxu1 %v4410_v55  ;;  %v4468_v54 = vld [vmem:[#allocation2 + $0x5a8] ss:$16 sps:$4 sm:$0xff]   ;;  %v4473_v55 = vld [vmem:[#allocation2 + $0x5c4] ss:$16 sps:$4 sm:$0xff]  }
  0x9e   :  { %2142 = vmatprep.mubr.bf16.mxu0 %v3474_v56  ;;  %2594 = vmatprep.mubr.bf16.mxu1 %v3474_v56  ;;  %v4476_v56 = vld [vmem:[#allocation2 + $0x5cc] ss:$16 sps:$4 sm:$0xff]  }
  0xa0   :  { %2210 = vmatpush1.bf16.msra.mxu0 %v4405_v57  ;;  %2662 = vmatpush1.bf16.msra.mxu1 %v4408_v58  ;;  %v4471_v57 = vld [vmem:[#allocation2 + $0x5c0] ss:$16 sps:$4 sm:$0xff]   ;;  %v4474_v58 = vld [vmem:[#allocation2 + $0x5c8] ss:$16 sps:$4 sm:$0xff]  }
  0xa1   :  { %2211 = vmatprep.subr.bf16.mxu0 %v4413_v59  ;;  %2663 = vmatprep.subr.bf16.mxu1 %v4416_v60  ;;  %v3513_v59 = vcombine.low %v92_v45, %v96_v47  ;;  %v37_v60 = vld [vmem:[%s5112_s0 + $0x10] sm:$0xff]  ;;  %v4530_v47 = vld [vmem:[#allocation2 + $0x6ec] ss:$16 sps:$4 sm:$0xff]  }
  0xa2   :  { %v73_v45 = vld [vmem:[%s5112_s0 + $0x130] sm:$0xff] }
  0xa3   :  { %2143 = vmatmul.mubr.bf16.gmra.mrb[8].mxu0 %v3473_v62  ;;  %2595 = vmatmul.mubr.bf16.gmra.mrb[8].mxu1 %v3473_v62  ;;  %v4479_v62 = vld [vmem:[#allocation2 + $0x5e4] ss:$16 sps:$4 sm:$0xff]  }
  0xa4   :  { %2212 = vmatpush1.bf16.msra.mxu0 %v4411_v0  ;;  %2664 = vmatpush1.bf16.msra.mxu1 %v4414_v1  ;;  %v3460_v0 = vcombine.high %v37_v60, %v41_v61  ;;  %v4477_v1 = vld [vmem:[#allocation2 + $0x5e0] ss:$16 sps:$4 sm:$0xff]  }
  0xa5   :  { %2213 = vmatprep.subr.bf16.mxu0 %v4419_v2  ;;  %2665 = vmatprep.subr.bf16.mxu1 %v4422_v3  ;;  %v4480_v2 = vld [vmem:[#allocation2 + $0x5e8] ss:$16 sps:$4 sm:$0xff]   ;;  %v4485_v3 = vld [vmem:[#allocation2 + $0x604] ss:$16 sps:$4 sm:$0xff]  }
  0xa6   :  { %2152 = vmatprep.mubr.bf16.mxu0 %v3482_v4  ;;  %2604 = vmatprep.mubr.bf16.mxu1 %v3482_v4  ;;  %v4488_v4 = vld [vmem:[#allocation2 + $0x60c] ss:$16 sps:$4 sm:$0xff]  }
  0xa8   :  { %2214 = vmatpush1.bf16.msra.mxu0 %v4417_v5  ;;  %2666 = vmatpush1.bf16.msra.mxu1 %v4420_v6  ;;  %v4483_v5 = vld [vmem:[#allocation2 + $0x600] ss:$16 sps:$4 sm:$0xff]   ;;  %v3459_v6 = vcombine.low %v37_v60, %v41_v61 }
  0xa9   :  { %2215 = vmatprep.subr.bf16.mxu0 %v4425_v7  ;;  %2667 = vmatprep.subr.bf16.mxu1 %v4428_v8  ;;  %v4486_v7 = vld [vmem:[#allocation2 + $0x608] ss:$16 sps:$4 sm:$0xff]   ;;  %v45_v8 = vld [vmem:[%s5112_s0 + $0x50] sm:$0xff] }
  0xaa   :  { %v4537_v61 = vld [vmem:[#allocation2 + $0x720] ss:$16 sps:$4 sm:$0xff]  }
  0xab   :  { %2153 = vmatmul.mubr.bf16.gmra.mrb[12].mxu0 %v3481_v10  ;;  %2605 = vmatmul.mubr.bf16.gmra.mrb[12].mxu1 %v3481_v10  ;;  %v4491_v10 = vld [vmem:[#allocation2 + $0x624] ss:$16 sps:$4 sm:$0xff]  }
  0xac   :  { %2216 = vmatpush1.bf16.msra.mxu0 %v4423_v12  ;;  %2668 = vmatpush1.bf16.msra.mxu1 %v4426_v13  ;;  %v4489_v12 = vld [vmem:[#allocation2 + $0x620] ss:$16 sps:$4 sm:$0xff]   ;;  %v3468_v13 = vcombine.high %v45_v8, %v49_v9 }
  0xad   :  { %2217 = vmatprep.subr.bf16.mxu0 %v4431_v14  ;;  %2669 = vmatprep.subr.bf16.mxu1 %v4434_v15  ;;  %v4492_v14 = vld [vmem:[#allocation2 + $0x628] ss:$16 sps:$4 sm:$0xff]   ;;  %v4497_v15 = vld [vmem:[#allocation2 + $0x644] ss:$16 sps:$4 sm:$0xff]  }
  0xae   :  { %2162 = vmatprep.mubr.bf16.mxu0 %v3490_v16  ;;  %2614 = vmatprep.mubr.bf16.mxu1 %v3490_v16  ;;  %v4500_v16 = vld [vmem:[#allocation2 + $0x64c] ss:$16 sps:$4 sm:$0xff]  }
  0xb0   :  { %2218 = vmatpush1.bf16.msra.mxu0 %v4429_v17  ;;  %2670 = vmatpush1.bf16.msra.mxu1 %v4432_v18  ;;  %v4495_v17 = vld [vmem:[#allocation2 + $0x640] ss:$16 sps:$4 sm:$0xff]   ;;  %v4498_v18 = vld [vmem:[#allocation2 + $0x648] ss:$16 sps:$4 sm:$0xff]  }
  0xb1   :  { %2219 = vmatprep.subr.bf16.mxu0 %v4437_v19  ;;  %2671 = vmatprep.subr.bf16.mxu1 %v4440_v20  ;;  %v53_v19 = vld [vmem:[%s5112_s0 + $0x90] sm:$0xff]  ;;  %v3467_v20 = vcombine.low %v45_v8, %v49_v9 }
  0xb2   :  { %v4549_v9 = vld [vmem:[#allocation2 + $0x760] ss:$16 sps:$4 sm:$0xff]  }
  0xb3   :  { %2163 = vmatmul.mubr.bf16.gmra.mrb[16].mxu0 %v3489_v23  ;;  %2615 = vmatmul.mubr.bf16.gmra.mrb[16].mxu1 %v3489_v23  ;;  %v4506_v23 = vld [vmem:[#allocation2 + $0x66c] ss:$16 sps:$4 sm:$0xff]  }
  0xb4   :  { %2220 = vmatpush1.bf16.msra.mxu0 %v4435_v21  ;;  %2672 = vmatpush1.bf16.msra.mxu1 %v4438_v22  ;;  %v57_v21 = vld [vmem:[%s5112_s0 + $0xb0] sm:$0xff] }
  0xb5   :  { %2221 = vmatprep.subr.bf16.mxu0 %v4443_v26  ;;  %2673 = vmatprep.subr.bf16.mxu1 %v4446_v27  ;;  %v4503_v22 = vld [vmem:[#allocation2 + $0x664] ss:$16 sps:$4 sm:$0xff]   ;;  %v3476_v25 = vcombine.high %v53_v19, %v57_v21  ;;  %v4504_v26 = vld [vmem:[#allocation2 + $0x668] ss:$16 sps:$4 sm:$0xff]  }
  0xb6   :  { %2172 = vmatprep.mubr.bf16.mxu0 %v3498_v28  ;;  %2624 = vmatprep.mubr.bf16.mxu1 %v3498_v28  ;;  %v4509_v27 = vld [vmem:[#allocation2 + $0x684] ss:$16 sps:$4 sm:$0xff]   ;;  %v4512_v28 = vld [vmem:[#allocation2 + $0x68c] ss:$16 sps:$4 sm:$0xff]  }
  0xb8   :  { %2222 = vmatpush1.bf16.msra.mxu0 %v4441_v29  ;;  %2674 = vmatpush1.bf16.msra.mxu1 %v4444_v30  ;;  %v4507_v29 = vld [vmem:[#allocation2 + $0x680] ss:$16 sps:$4 sm:$0xff]   ;;  %v4510_v30 = vld [vmem:[#allocation2 + $0x688] ss:$16 sps:$4 sm:$0xff]  }
  0xb9   :  { %2223 = vmatprep.subr.bf16.mxu0 %v4449_v31  ;;  %2675 = vmatprep.subr.bf16.mxu1 %v4452_v32  ;;  %v61_v31 = vld [vmem:[%s5112_s0 + $0xd0] sm:$0xff]  ;;  %v3475_v32 = vcombine.low %v53_v19, %v57_v21  ;;  %v4566_v19 = vld [vmem:[#allocation2 + $0x7ac] ss:$16 sps:$4 sm:$0xff]  }
  0xba   :  { %v4561_v21 = vld [vmem:[#allocation2 + $0x7a0] ss:$16 sps:$4 sm:$0xff]  }
  0xbb   :  { %2173 = vmatmul.mubr.bf16.gmra.mrb[20].mxu0 %v3497_v34  ;;  %2625 = vmatmul.mubr.bf16.gmra.mrb[20].mxu1 %v3497_v34  ;;  %v4515_v34 = vld [vmem:[#allocation2 + $0x6a4] ss:$16 sps:$4 sm:$0xff]  }
  0xbc   :  { %2224 = vmatpush1.bf16.msra.mxu0 %v4447_v36  ;;  %2676 = vmatpush1.bf16.msra.mxu1 %v4450_v37  ;;  %v4513_v36 = vld [vmem:[#allocation2 + $0x6a0] ss:$16 sps:$4 sm:$0xff]   ;;  %v3484_v37 = vcombine.high %v61_v31, %v65_v33 }
  0xbd   :  { %2225 = vmatprep.subr.bf16.mxu0 %v4455_v38  ;;  %2677 = vmatprep.subr.bf16.mxu1 %v4458_v39  ;;  %v4516_v38 = vld [vmem:[#allocation2 + $0x6a8] ss:$16 sps:$4 sm:$0xff]   ;;  %v4521_v39 = vld [vmem:[#allocation2 + $0x6c4] ss:$16 sps:$4 sm:$0xff]  }
  0xbe   :  { %2182 = vmatprep.mubr.bf16.mxu0 %v3506_v40  ;;  %2634 = vmatprep.mubr.bf16.mxu1 %v3506_v40  ;;  %v4524_v40 = vld [vmem:[#allocation2 + $0x6cc] ss:$16 sps:$4 sm:$0xff]  }
  0xc0   :  { %2226 = vmatpush1.bf16.msra.mxu0 %v4453_v41  ;;  %2678 = vmatpush1.bf16.msra.mxu1 %v4456_v42  ;;  %v4519_v41 = vld [vmem:[#allocation2 + $0x6c0] ss:$16 sps:$4 sm:$0xff]   ;;  %v4522_v42 = vld [vmem:[#allocation2 + $0x6c8] ss:$16 sps:$4 sm:$0xff]  }
  0xc1   :  { %2227 = vmatprep.subr.bf16.mxu0 %v4461_v43  ;;  %2679 = vmatprep.subr.bf16.mxu1 %v4464_v44  ;;  %v69_v43 = vld [vmem:[%s5112_s0 + $0x110] sm:$0xff]  ;;  %v3483_v44 = vcombine.low %v61_v31, %v65_v33  ;;  %v4578_v31 = vld [vmem:[#allocation2 + $0x7ec] ss:$16 sps:$4 sm:$0xff]  }
  0xc2   :  { %v4573_v33 = vld [vmem:[#allocation2 + $0x7e0] ss:$16 sps:$4 sm:$0xff]  }
  0xc3   :  { %2183 = vmatmul.mubr.bf16.gmra.mrb[24].mxu0 %v3505_v46  ;;  %2635 = vmatmul.mubr.bf16.gmra.mrb[24].mxu1 %v3505_v46  ;;  %v4527_v46 = vld [vmem:[#allocation2 + $0x6e4] ss:$16 sps:$4 sm:$0xff]  }
  0xc4   :  { %2228 = vmatpush1.bf16.msra.mxu0 %v4459_v48  ;;  %2680 = vmatpush1.bf16.msra.mxu1 %v4462_v49  ;;  %v4525_v48 = vld [vmem:[#allocation2 + $0x6e0] ss:$16 sps:$4 sm:$0xff]   ;;  %v4528_v49 = vld [vmem:[#allocation2 + $0x6e8] ss:$16 sps:$4 sm:$0xff]  }
  0xc5   :  { %2229 = vmatprep.subr.bf16.mxu0 %v4467_v50  ;;  %2681 = vmatprep.subr.bf16.mxu1 %v4470_v51  ;;  %v3492_v50 = vcombine.high %v69_v43, %v73_v45  ;;  %v4533_v51 = vld [vmem:[#allocation2 + $0x704] ss:$16 sps:$4 sm:$0xff]  }
  0xc6   :  { %2192 = vmatprep.mubr.bf16.mxu0 %v3514_v52  ;;  %2644 = vmatprep.mubr.bf16.mxu1 %v3514_v52  ;;  %v4536_v52 = vld [vmem:[#allocation2 + $0x70c] ss:$16 sps:$4 sm:$0xff]  }
  0xc8   :  { %2230 = vmatpush1.bf16.msra.mxu0 %v4465_v53  ;;  %2682 = vmatpush1.bf16.msra.mxu1 %v4468_v54  ;;  %v3491_v53 = vcombine.low %v69_v43, %v73_v45  ;;  %v77_v54 = vld [vmem:[%s5112_s0 + $0x150] sm:$0xff]  ;;  %v4583_v43 = vld [vmem:[%s5115_s3 + $0x48] sm:$0xff]   ;;  %v54_v45 = vld [vmem:[%s5112_s0 + $0x98] sm:$0xff] }
  0xc9   :  { %2231 = vmatprep.subr.bf16.mxu0 %v4473_v55  ;;  %2683 = vmatprep.subr.bf16.mxu1 %v4476_v56  ;;  %v81_v55 = vld [vmem:[%s5112_s0 + $0x170] sm:$0xff] }
  0xca   :  { %v4531_v56 = vld [vmem:[#allocation2 + $0x700] ss:$16 sps:$4 sm:$0xff]   ;;  %v3500_v60 = vcombine.high %v77_v54, %v81_v55 }
  0xcb   :  { %2193 = vmatmul.mubr.bf16.gmra.mrb[28].mxu0 %v3513_v59  ;;  %2645 = vmatmul.mubr.bf16.gmra.mrb[28].mxu1 %v3513_v59  ;;  %v4542_v59 = vld [vmem:[#allocation2 + $0x72c] ss:$16 sps:$4 sm:$0xff]  }
  0xcc   :  { %2232 = vmatpush1.bf16.msra.mxu0 %v4471_v57  ;;  %2684 = vmatpush1.bf16.msra.mxu1 %v4474_v58  ;;  %v4534_v57 = vld [vmem:[#allocation2 + $0x708] ss:$16 sps:$4 sm:$0xff]   ;;  %v4539_v58 = vld [vmem:[#allocation2 + $0x724] ss:$16 sps:$4 sm:$0xff]  }
  0xcd   :  { %2233 = vmatprep.subr.bf16.mxu0 %v4479_v62  ;;  %2685 = vmatprep.subr.bf16.mxu1 %v4482_v63  ;;  %v4540_v62 = vld [vmem:[#allocation2 + $0x728] ss:$16 sps:$4 sm:$0xff]   ;;  %v4545_v63 = vld [vmem:[#allocation2 + $0x744] ss:$16 sps:$4 sm:$0xff]  }
  0xce   :  { %2235 = vmatprep.mubr.bf16.mxu0 %v3460_v0  ;;  %2687 = vmatprep.mubr.bf16.mxu1 %v3460_v0  ;;  %v4548_v0 = vld [vmem:[#allocation2 + $0x74c] ss:$16 sps:$4 sm:$0xff]  }
  0xd0   :  { %2234 = vmatpush1.bf16.msra.mxu0 %v4477_v1  ;;  %2686 = vmatpush1.bf16.msra.mxu1 %v4480_v2  ;;  %v3499_v1 = vcombine.low %v77_v54, %v81_v55  ;;  %v85_v2 = vld [vmem:[%s5112_s0 + $0x190] sm:$0xff]  ;;  %v4591_v55 = vld [vmem:[%s5115_s3 + $0x58] sm:$0xff]  }
  0xd1   :  { %2316 = vmatprep.subr.bf16.mxu0 %v4485_v3  ;;  %2768 = vmatprep.subr.bf16.mxu1 %v4488_v4  ;;  %v89_v3 = vld [vmem:[%s5112_s0 + $0x1b0] sm:$0xff] }
  0xd2   :  { %v4543_v4 = vld [vmem:[#allocation2 + $0x740] ss:$16 sps:$4 sm:$0xff]   ;;  %v3508_v8 = vcombine.high %v85_v2, %v89_v3 }
  0xd3   :  { %2236 = vmatmul.mubr.bf16.vlgmr.msra.gmra.mrb[0].mxu0 %v3459_v6  ;;  %2688 = vmatmul.mubr.bf16.vlgmr.msra.gmra.mrb[0].mxu1 %v3459_v6  ;;  %v4551_v6 = vld [vmem:[#allocation2 + $0x764] ss:$16 sps:$4 sm:$0xff]  }
  0xd4   :  { %2317 = vmatpush1.bf16.msra.mxu0 %v4483_v5  ;;  %2769 = vmatpush1.bf16.msra.mxu1 %v4486_v7  ;;  %v4546_v5 = vld [vmem:[#allocation2 + $0x748] ss:$16 sps:$4 sm:$0xff]   ;;  %v4554_v7 = vld [vmem:[#allocation2 + $0x76c] ss:$16 sps:$4 sm:$0xff]   ;;  %v4590_v54 = vld [vmem:[%s5115_s3 + $0x90] sm:$0xff]  }
  0xd5   :  { %2318 = vmatprep.subr.bf16.mxu0 %v4491_v10  ;;  %2770 = vmatprep.subr.bf16.mxu1 %v4494_v11  ;;  %v4552_v10 = vld [vmem:[#allocation2 + $0x768] ss:$16 sps:$4 sm:$0xff]   ;;  %v4557_v11 = vld [vmem:[#allocation2 + $0x784] ss:$16 sps:$4 sm:$0xff]  }
  0xd6   :  { %2245 = vmatprep.mubr.bf16.mxu0 %v3468_v13  ;;  %2697 = vmatprep.mubr.bf16.mxu1 %v3468_v13  ;;  %v3507_v13 = vcombine.low %v85_v2, %v89_v3  ;;  %v4598_v2 = vld [vmem:[%s5115_s3 + $0xa0] sm:$0xff]   ;;  %v4599_v3 = vld [vmem:[%s5115_s3 + $0x68] sm:$0xff]  }
  0xd8   :  { %2319 = vmatpush1.bf16.msra.mxu0 %v4489_v12  ;;  %2771 = vmatpush1.bf16.msra.mxu1 %v4492_v14  ;;  %v4560_v12 = vld [vmem:[#allocation2 + $0x78c] ss:$16 sps:$4 sm:$0xff]   ;;  %v93_v14 = vld [vmem:[%s5112_s0 + $0x1d0] sm:$0xff] }
  0xd9   :  { %2320 = vmatprep.subr.bf16.mxu0 %v4497_v15  ;;  %2772 = vmatprep.subr.bf16.mxu1 %v4500_v16  ;;  %v97_v15 = vld [vmem:[%s5112_s0 + $0x1f0] sm:$0xff] }
  0xda   :  { %v4555_v16 = vld [vmem:[#allocation2 + $0x780] ss:$16 sps:$4 sm:$0xff]  }
  0xdb   :  { %2246 = vmatmul.mubr.bf16.gmra.mrb[4].mxu0 %v3467_v20  ;;  %2698 = vmatmul.mubr.bf16.gmra.mrb[4].mxu1 %v3467_v20  ;;  %v3516_v20 = vcombine.high %v93_v14, %v97_v15 }
  0xdc   :  { %2321 = vmatpush1.bf16.msra.mxu0 %v4495_v17  ;;  %2773 = vmatpush1.bf16.msra.mxu1 %v4498_v18  ;;  %v4558_v17 = vld [vmem:[#allocation2 + $0x788] ss:$16 sps:$4 sm:$0xff]   ;;  %v4563_v18 = vld [vmem:[#allocation2 + $0x7a4] ss:$16 sps:$4 sm:$0xff]  }
  0xdd   :  { %2322 = vmatprep.subr.bf16.mxu0 %v4503_v22  ;;  %2774 = vmatprep.subr.bf16.mxu1 %v4506_v23  ;;  %v4564_v22 = vld [vmem:[#allocation2 + $0x7a8] ss:$16 sps:$4 sm:$0xff]   ;;  %v4569_v23 = vld [vmem:[#allocation2 + $0x7c4] ss:$16 sps:$4 sm:$0xff]  }
  0xde   :  { %2255 = vmatprep.mubr.bf16.mxu0 %v3476_v25  ;;  %2707 = vmatprep.mubr.bf16.mxu1 %v3476_v25  ;;  %v3515_v25 = vcombine.low %v93_v14, %v97_v15  ;;  %v4606_v14 = vld [vmem:[%s5115_s3 + $0xb0] sm:$0xff]   ;;  %v78_v15 = vld [vmem:[%s5112_s0 + $0x158] sm:$0xff] }
  0xe0   :  { %2323 = vmatpush1.bf16.msra.mxu0 %v4501_v24  ;;  %2775 = vmatpush1.bf16.msra.mxu1 %v4504_v26  ;;  %v4572_v24 = vld [vmem:[#allocation2 + $0x7cc] ss:$16 sps:$4 sm:$0xff]  }
  0xe1   :  { %2324 = vmatprep.subr.bf16.mxu0 %v4509_v27  ;;  %2776 = vmatprep.subr.bf16.mxu1 %v4512_v28  ;;  %v38_v26 = vld [vmem:[%s5112_s0 + $0x18] sm:$0xff]  ;;  %v4567_v28 = vld [vmem:[#allocation2 + $0x7c0] ss:$16 sps:$4 sm:$0xff]  }
  0xe2   :  { %v42_v27 = vld [vmem:[%s5112_s0 + $0x38] sm:$0xff] }
  0xe3   :  { %2256 = vmatmul.mubr.bf16.gmra.mrb[8].mxu0 %v3475_v32  ;;  %2708 = vmatmul.mubr.bf16.gmra.mrb[8].mxu1 %v3475_v32  ;;  %v3462_v32 = vcombine.high %v38_v26, %v42_v27 }
  0xe4   :  { %2325 = vmatpush1.bf16.msra.mxu0 %v4507_v29  ;;  %2777 = vmatpush1.bf16.msra.mxu1 %v4510_v30  ;;  %v4570_v29 = vld [vmem:[#allocation2 + $0x7c8] ss:$16 sps:$4 sm:$0xff]   ;;  %v4575_v30 = vld [vmem:[#allocation2 + $0x7e4] ss:$16 sps:$4 sm:$0xff]  }
  0xe5   :  { %2326 = vmatprep.subr.bf16.mxu0 %v4515_v34  ;;  %2778 = vmatprep.subr.bf16.mxu1 %v4518_v35  ;;  %v4576_v34 = vld [vmem:[#allocation2 + $0x7e8] ss:$16 sps:$4 sm:$0xff]  }
  0xe6   :  { %2265 = vmatprep.mubr.bf16.mxu0 %v3484_v37  ;;  %2717 = vmatprep.mubr.bf16.mxu1 %v3484_v37  ;;  %v46_v35 = vld [vmem:[%s5112_s0 + $0x58] sm:$0xff]  ;;  %v4579_v37 = vld [vmem:[%s5115_s3 + $0x40] sm:$0xff]  }
  0xe8   :  { %2327 = vmatpush1.bf16.msra.mxu0 %v4513_v36  ;;  %2779 = vmatpush1.bf16.msra.mxu1 %v4516_v38  ;;  %v50_v36 = vld [vmem:[%s5112_s0 + $0x78] sm:$0xff]  ;;  %v4581_v38 = vld [vmem:[%s5115_s3 + $0xc0] sm:$0xff]  }
  0xe9   :  { %2328 = vmatprep.subr.bf16.mxu0 %v4521_v39  ;;  %2780 = vmatprep.subr.bf16.mxu1 %v4524_v40  ;;  %v3461_v39 = vcombine.low %v38_v26, %v42_v27  ;;  %v3470_v40 = vcombine.high %v46_v35, %v50_v36 }
  0xeb   :  { %2266 = vmatmul.mubr.bf16.gmra.mrb[12].mxu0 %v3483_v44  ;;  %2718 = vmatmul.mubr.bf16.gmra.mrb[12].mxu1 %v3483_v44  ;;  %v4585_v44 = vld [vmem:[%s5115_s3 + $0xc8] sm:$0xff]  }
  0xec   :  { %2329 = vmatpush1.bf16.msra.mxu0 %v4519_v41  ;;  %2781 = vmatpush1.bf16.msra.mxu1 %v4522_v42  ;;  %v4580_v41 = vld [vmem:[%s5115_s3] sm:$0xff]  }
  0xed   :  { %2330 = vmatprep.subr.bf16.mxu0 %v4527_v46  ;;  %2782 = vmatprep.subr.bf16.mxu1 %v4530_v47  ;;  %v4582_v42 = vld [vmem:[%s5115_s3 + $0x80] sm:$0xff]   ;;  %v58_v46 = vld [vmem:[%s5112_s0 + $0xb8] sm:$0xff]  ;;  %v4584_v47 = vld [vmem:[%s5115_s3 + $0x8] sm:$0xff]  }
  0xee   :  { %2275 = vmatprep.mubr.bf16.mxu0 %v3492_v50  ;;  %2727 = vmatprep.mubr.bf16.mxu1 %v3492_v50  ;;  %v4589_v50 = vld [vmem:[%s5115_s3 + $0xd0] sm:$0xff]  }
  0xf0   :  { %2331 = vmatpush1.bf16.msra.mxu0 %v4525_v48  ;;  %2783 = vmatpush1.bf16.msra.mxu1 %v4528_v49  ;;  %v4586_v48 = vld [vmem:[%s5115_s3 + $0x88] sm:$0xff]   ;;  %v4587_v49 = vld [vmem:[%s5115_s3 + $0x50] sm:$0xff]  }
  0xf1   :  { %2332 = vmatprep.subr.bf16.mxu0 %v4533_v51  ;;  %2784 = vmatprep.subr.bf16.mxu1 %v4536_v52  ;;  %v3469_v51 = vcombine.low %v46_v35, %v50_v36  ;;  %v3478_v52 = vcombine.high %v54_v45, %v58_v46  ;;  %v355_v36 = vld [vmem:[%s5114_s2] sm:$0xf] }
  0xf3   :  { %2276 = vmatmul.mubr.bf16.gmra.mrb[16].mxu0 %v3491_v53  ;;  %2728 = vmatmul.mubr.bf16.gmra.mrb[16].mxu1 %v3491_v53  ;;  %v4588_v53 = vld [vmem:[%s5115_s3 + $0x10] sm:$0xff]  }
  0xf4   :  { %2333 = vmatpush1.bf16.msra.mxu0 %v4531_v56  ;;  %2785 = vmatpush1.bf16.msra.mxu1 %v4534_v57  ;;  %v4593_v56 = vld [vmem:[%s5115_s3 + $0xd8] sm:$0xff]  }
  0xf5   :  { %2334 = vmatprep.subr.bf16.mxu0 %v4539_v58  ;;  %2786 = vmatprep.subr.bf16.mxu1 %v4542_v59  ;;  %v62_v57 = vld [vmem:[%s5112_s0 + $0xd8] sm:$0xff] }
  0xf6   :  { %2285 = vmatprep.mubr.bf16.mxu0 %v3500_v60  ;;  %2737 = vmatprep.mubr.bf16.mxu1 %v3500_v60  ;;  %v66_v58 = vld [vmem:[%s5112_s0 + $0xf8] sm:$0xff] }
  0xf7   :  { %v4592_v59 = vld [vmem:[%s5115_s3 + $0x18] sm:$0xff]  }
  0xf8   :  { %2335 = vmatpush1.bf16.msra.mxu0 %v4537_v61  ;;  %2787 = vmatpush1.bf16.msra.mxu1 %v4540_v62  ;;  %v4594_v60 = vld [vmem:[%s5115_s3 + $0x98] sm:$0xff]   ;;  %v4595_v61 = vld [vmem:[%s5115_s3 + $0x60] sm:$0xff]  }
  0xf9   :  { %2336 = vmatprep.subr.bf16.mxu0 %v4545_v63  ;;  %2788 = vmatprep.subr.bf16.mxu1 %v4548_v0  ;;  %v4597_v62 = vld [vmem:[%s5115_s3 + $0xe0] sm:$0xff]   ;;  %v3477_v63 = vcombine.low %v54_v45, %v58_v46  ;;  %v3486_v0 = vcombine.high %v62_v57, %v66_v58 }
  0xfb   :  { %2286 = vmatmul.mubr.bf16.gmra.mrb[20].mxu0 %v3499_v1  ;;  %2738 = vmatmul.mubr.bf16.gmra.mrb[20].mxu1 %v3499_v1  ;;  %v4596_v1 = vld [vmem:[%s5115_s3 + $0x20] sm:$0xff]  }
  0xfc   :  { %2337 = vmatpush1.bf16.msra.mxu0 %v4543_v4  ;;  %2789 = vmatpush1.bf16.msra.mxu1 %v4546_v5  ;;  %v4601_v4 = vld [vmem:[%s5115_s3 + $0xe8] sm:$0xff]   ;;  %v70_v5 = vld [vmem:[%s5112_s0 + $0x118] sm:$0xff] }
  0xfd   :  { %2338 = vmatprep.subr.bf16.mxu0 %v4551_v6  ;;  %2790 = vmatprep.subr.bf16.mxu1 %v4554_v7  ;;  %v74_v6 = vld [vmem:[%s5112_s0 + $0x138] sm:$0xff]  ;;  %v4600_v7 = vld [vmem:[%s5115_s3 + $0x28] sm:$0xff]  }
  0xfe   :  { %2295 = vmatprep.mubr.bf16.mxu0 %v3508_v8  ;;  %2747 = vmatprep.mubr.bf16.mxu1 %v3508_v8  ;;  %v4602_v8 = vld [vmem:[%s5115_s3 + $0xa8] sm:$0xff]  }
 0x100   :  { %2339 = vmatpush1.bf16.msra.mxu0 %v4549_v9  ;;  %2791 = vmatpush1.bf16.msra.mxu1 %v4552_v10  ;;  %v4603_v9 = vld [vmem:[%s5115_s3 + $0x70] sm:$0xff]  }
 0x101   :  { %2340 = vmatprep.subr.bf16.mxu0 %v4557_v11  ;;  %2792 = vmatprep.subr.bf16.mxu1 %v4560_v12  ;;  %v4605_v10 = vld [vmem:[%s5115_s3 + $0xf0] sm:$0xff]   ;;  %v3485_v11 = vcombine.low %v62_v57, %v66_v58  ;;  %v3494_v12 = vcombine.high %v70_v5, %v74_v6 }
 0x103   :  { %2296 = vmatmul.mubr.bf16.gmra.mrb[24].mxu0 %v3507_v13  ;;  %2748 = vmatmul.mubr.bf16.gmra.mrb[24].mxu1 %v3507_v13  ;;  %v4604_v13 = vld [vmem:[%s5115_s3 + $0x30] sm:$0xff]  }
 0x104   :  { %2341 = vmatpush1.bf16.msra.mxu0 %v4555_v16  ;;  %2793 = vmatpush1.bf16.msra.mxu1 %v4558_v17  ;;  %v82_v16 = vld [vmem:[%s5112_s0 + $0x178] sm:$0xff]  ;;  %v3493_v17 = vcombine.low %v70_v5, %v74_v6 }
 0x105   :  { %2342 = vmatprep.subr.bf16.mxu0 %v4563_v18  ;;  %2794 = vmatprep.subr.bf16.mxu1 %v4566_v19  ;;  %v3502_v18 = vcombine.high %v78_v15, %v82_v16  ;;  %v86_v19 = vld [vmem:[%s5112_s0 + $0x198] sm:$0xff] }
 0x106   :  { %2305 = vmatprep.mubr.bf16.mxu0 %v3516_v20  ;;  %2757 = vmatprep.mubr.bf16.mxu1 %v3516_v20  ;;  %v90_v20 = vld [vmem:[%s5112_s0 + $0x1b8] sm:$0xff] }
 0x108   :  { %2343 = vmatpush1.bf16.msra.mxu0 %v4561_v21  ;;  %2795 = vmatpush1.bf16.msra.mxu1 %v4564_v22  ;;  %v3501_v21 = vcombine.low %v78_v15, %v82_v16  ;;  %v3510_v22 = vcombine.high %v86_v19, %v90_v20 }
 0x109   :  { %2344 = vmatprep.subr.bf16.mxu0 %v4569_v23  ;;  %2796 = vmatprep.subr.bf16.mxu1 %v4572_v24  ;;  %v94_v23 = vld [vmem:[%s5112_s0 + $0x1d8] sm:$0xff] }
 0x10a   :  { %v98_v24 = vld [vmem:[%s5112_s0 + $0x1f8] sm:$0xff] }
 0x10b   :  { %2306 = vmatmul.mubr.bf16.gmra.mrb[28].mxu0 %v3515_v25  ;;  %2758 = vmatmul.mubr.bf16.gmra.mrb[28].mxu1 %v3515_v25  ;;  %v3509_v25 = vcombine.low %v86_v19, %v90_v20  ;;  %v3518_v26 = vcombine.high %v94_v23, %v98_v24  ;;  %v3517_v27 = vcombine.low %v94_v23, %v98_v24 }
 0x10c   :  { %2345 = vmatpush1.bf16.msra.mxu0 %v4567_v28  ;;  %2797 = vmatpush1.bf16.msra.mxu1 %v4570_v29  ;;  %v4607_v28 = vld [vmem:[%s5115_s3 + $0x78] sm:$0xff]  }
 0x10d   :  { %2346 = vmatprep.subr.bf16.mxu0 %v4575_v30  ;;  %2798 = vmatprep.subr.bf16.mxu1 %v4578_v31  ;;  %v4609_v29 = vld [vmem:[%s5115_s3 + $0xf8] sm:$0xff]  }
 0x10e   :  { %2348 = vmatprep.mubr.bf16.mxu0 %v3462_v32  ;;  %2800 = vmatprep.mubr.bf16.mxu1 %v3462_v32  ;;  %v4608_v30 = vld [vmem:[%s5115_s3 + $0x38] sm:$0xff]   ;;  %v357_v32 = vlaneseq }
 0x10f   :  { %v4610_v31 = vld [vmem:[%s5115_s3 + $0xb8] sm:$0xff]  }
 0x110   :  { %2347 = vmatpush1.bf16.msra.mxu0 %v4573_v33  ;;  %2799 = vmatpush1.bf16.msra.mxu1 %v4576_v34  ;;  %v358_v33 = vshrl.u32 %v357_v32, 7 }
 0x111   :  { %3808 = vmatprep.subr.bf16.mxu0 %v4579_v37  ;;  %3872 = vmatprep.subr.bf16.mxu1 %v4581_v38 }
 0x112   :  { %v359_v34 = vsub.s32 0, %v358_v33  ;;  %v367_v35 = vsub.s32 2, %v358_v33  ;;  %v363_v37 = vsub.s32 1, %v358_v33  ;;  %v371_v38 = vsub.s32 3, %v358_v33 }
 0x113   :  { %2349 = vmatmul.mubr.bf16.vlgmr.msra.gmra.mrb[0].mxu0 %v3461_v39  ;;  %2801 = vmatmul.mubr.bf16.vlgmr.msra.gmra.mrb[0].mxu1 %v3461_v39 }
 0x114   :  { %2358 = vmatprep.mubr.bf16.mxu0 %v3470_v40  ;;  %2810 = vmatprep.mubr.bf16.mxu1 %v3470_v40  ;;  %v4971_v39 = vrot.slane %v355_v36, %v359_v34  ;;  %v4973_v40 = vrot.slane %v355_v36, %v367_v35 }
 0x115   :  { %3809 = vmatpush3.bf16.msra.mxu0 %v4580_v41  ;;  %3873 = vmatpush3.bf16.msra.mxu1 %v4582_v42  ;;  %v4975_v41 = vrot.slane %v355_v36, %v363_v37  ;;  %v4977_v42 = vrot.slane %v355_v36, %v371_v38 }
 0x116   :  { %3810 = vmatprep.subr.bf16.mxu0 %v4583_v43  ;;  %3874 = vmatprep.subr.bf16.mxu1 %v4585_v44 }
 0x119   :  { %3811 = vmatpush3.bf16.msra.mxu0 %v4584_v47  ;;  %3875 = vmatpush3.bf16.msra.mxu1 %v4586_v48 }
 0x11a   :  { %3812 = vmatprep.subr.bf16.mxu0 %v4587_v49  ;;  %3876 = vmatprep.subr.bf16.mxu1 %v4589_v50 }
 0x11b   :  { %2359 = vmatmul.mubr.bf16.gmra.mrb[4].mxu0 %v3469_v51  ;;  %2811 = vmatmul.mubr.bf16.gmra.mrb[4].mxu1 %v3469_v51 }
 0x11c   :  { %2368 = vmatprep.mubr.bf16.mxu0 %v3478_v52  ;;  %2820 = vmatprep.mubr.bf16.mxu1 %v3478_v52 }
 0x11d   :  { %3813 = vmatpush3.bf16.msra.mxu0 %v4588_v53  ;;  %3877 = vmatpush3.bf16.msra.mxu1 %v4590_v54 }
 0x11e   :  { %3814 = vmatprep.subr.bf16.mxu0 %v4591_v55  ;;  %3878 = vmatprep.subr.bf16.mxu1 %v4593_v56 }
 0x121   :  { %3815 = vmatpush3.bf16.msra.mxu0 %v4592_v59  ;;  %3879 = vmatpush3.bf16.msra.mxu1 %v4594_v60 }
 0x122   :  { %3816 = vmatprep.subr.bf16.mxu0 %v4595_v61  ;;  %3880 = vmatprep.subr.bf16.mxu1 %v4597_v62 }
 0x123   :  { %2369 = vmatmul.mubr.bf16.gmra.mrb[8].mxu0 %v3477_v63  ;;  %2821 = vmatmul.mubr.bf16.gmra.mrb[8].mxu1 %v3477_v63 }
 0x124   :  { %2378 = vmatprep.mubr.bf16.mxu0 %v3486_v0  ;;  %2830 = vmatprep.mubr.bf16.mxu1 %v3486_v0 }
 0x125   :  { %3817 = vmatpush3.bf16.msra.mxu0 %v4596_v1  ;;  %3881 = vmatpush3.bf16.msra.mxu1 %v4598_v2 }
 0x126   :  { %3818 = vmatprep.subr.bf16.mxu0 %v4599_v3  ;;  %3882 = vmatprep.subr.bf16.mxu1 %v4601_v4 }
 0x129   :  { %3819 = vmatpush3.bf16.msra.mxu0 %v4600_v7  ;;  %3883 = vmatpush3.bf16.msra.mxu1 %v4602_v8 }
 0x12a   :  { %3820 = vmatprep.subr.bf16.mxu0 %v4603_v9  ;;  %3884 = vmatprep.subr.bf16.mxu1 %v4605_v10 }
 0x12b   :  { %2379 = vmatmul.mubr.bf16.gmra.mrb[12].mxu0 %v3485_v11  ;;  %2831 = vmatmul.mubr.bf16.gmra.mrb[12].mxu1 %v3485_v11 }
 0x12c   :  { %2388 = vmatprep.mubr.bf16.mxu0 %v3494_v12  ;;  %2840 = vmatprep.mubr.bf16.mxu1 %v3494_v12 }
 0x12d   :  { %3821 = vmatpush3.bf16.msra.mxu0 %v4604_v13  ;;  %3885 = vmatpush3.bf16.msra.mxu1 %v4606_v14 }
 0x12e   :  { %3822 = vmatprep.subr.bf16.mxu0 %v4607_v28  ;;  %3886 = vmatprep.subr.bf16.mxu1 %v4609_v29 }
 0x131   :  { %3823 = vmatpush3.bf16.msra.mxu0 %v4608_v30  ;;  %3887 = vmatpush3.bf16.msra.mxu1 %v4610_v31 }
 0x133   :  { %2389 = vmatmul.mubr.bf16.gmra.mrb[16].mxu0 %v3493_v17  ;;  %2841 = vmatmul.mubr.bf16.gmra.mrb[16].mxu1 %v3493_v17 }
 0x134   :  { %2398 = vmatprep.mubr.bf16.mxu0 %v3502_v18  ;;  %2850 = vmatprep.mubr.bf16.mxu1 %v3502_v18 }
 0x13b   :  { %2399 = vmatmul.mubr.bf16.gmra.mrb[20].mxu0 %v3501_v21  ;;  %2851 = vmatmul.mubr.bf16.gmra.mrb[20].mxu1 %v3501_v21 }
 0x13c   :  { %2408 = vmatprep.mubr.bf16.mxu0 %v3510_v22  ;;  %2860 = vmatprep.mubr.bf16.mxu1 %v3510_v22 }
 0x143   :  { %2409 = vmatmul.mubr.bf16.gmra.mrb[24].mxu0 %v3509_v25  ;;  %2861 = vmatmul.mubr.bf16.gmra.mrb[24].mxu1 %v3509_v25 }
 0x144   :  { %2418 = vmatprep.mubr.bf16.mxu0 %v3518_v26  ;;  %2870 = vmatprep.mubr.bf16.mxu1 %v3518_v26 }
 0x14b   :  { %2419 = vmatmul.mubr.bf16.gmra.mrb[28].mxu0 %v3517_v27  ;;  %2871 = vmatmul.mubr.bf16.gmra.mrb[28].mxu1 %v3517_v27 }
 0x1e6   :  { %v2350_v43 = vpop.f32.mrb[0].mxu0  ;;  %v2802_v44 = vpop.f32.mrb[0].mxu1 }
 0x1e7   :  { %v3936_v45 = vadd.f32 %v2350_v43, %v4971_v39  ;;  %v3968_v46 = vadd.f32 %v2802_v44, %v4973_v40  ;;  %v2352_v47 = vpop.f32.mrb[1].mxu0  ;;  %v2804_v48 = vpop.f32.mrb[1].mxu1 }
 0x1e8   :  { %v3937_v49 = vadd.f32 %v2352_v47, %v4975_v41  ;;  %v3969_v50 = vadd.f32 %v2804_v48, %v4977_v42  ;;  %v2354_v51 = vpop.f32.mrb[2].mxu0  ;;  %v2806_v52 = vpop.f32.mrb[2].mxu1 }
 0x1e9   :  { %v3938_v53 = vadd.f32 %v2354_v51, %v4971_v39  ;;  %v3970_v54 = vadd.f32 %v2806_v52, %v4973_v40  ;;  %v2356_v55 = vpop.f32.mrb[3].mxu0  ;;  %v2808_v56 = vpop.f32.mrb[3].mxu1  ;;  %v2881_v59 = vmax.f32 %v3936_v45, 0.0  ;;  %v2883_v60 = vmax.f32 %v3968_v46, 0.0 }
 0x1ea   :  { %v3939_v57 = vadd.f32 %v2356_v55, %v4975_v41  ;;  %v3971_v58 = vadd.f32 %v2808_v56, %v4977_v42  ;;  %v2882_v63 = vmax.f32 %v3937_v49, 0.0  ;;  %v2884_v0 = vmax.f32 %v3969_v50, 0.0 }
 0x1eb   :  { %v2885_v61 = vmax.f32 %v3938_v53, 0.0  ;;  %v2887_v62 = vmax.f32 %v3970_v54, 0.0 }
 0x1ec   :  { %v2886_v1 = vmax.f32 %v3939_v57, 0.0  ;;  %v2888_v2 = vmax.f32 %v3971_v58, 0.0 }
 0x1ed   :  { %v2945_v3 = vpack.c.bf16 %v2885_v61, %v2881_v59  ;;  %v2947_v4 = vpack.c.bf16 %v2887_v62, %v2883_v60 }
 0x1ee   :  { %v2946_v5 = vpack.c.bf16 %v2886_v1, %v2882_v63  ;;  %v2948_v6 = vpack.c.bf16 %v2888_v2, %v2884_v0  ;;  %v2360_v7 = vpop.f32.mrb[4].mxu0  ;;  %v2812_v8 = vpop.f32.mrb[4].mxu1 }
 0x1ef   :  { %v3940_v9 = vadd.f32 %v2360_v7, %v4971_v39  ;;  %v3972_v10 = vadd.f32 %v2812_v8, %v4973_v40  ;;  %v2362_v11 = vpop.f32.mrb[5].mxu0  ;;  %v2814_v12 = vpop.f32.mrb[5].mxu1 }
 0x1f0   :  { %v3941_v13 = vadd.f32 %v2362_v11, %v4975_v41  ;;  %v3973_v14 = vadd.f32 %v2814_v12, %v4977_v42  ;;  %v2364_v15 = vpop.f32.mrb[6].mxu0  ;;  %v2816_v16 = vpop.f32.mrb[6].mxu1  ;;  %3272 = vmatprep.mubr.bf16.mxu0 %v2946_v5  ;;  %3369 = vmatprep.mubr.bf16.mxu1 %v2948_v6 }
 0x1f1   :  { %v3942_v17 = vadd.f32 %v2364_v15, %v4971_v39  ;;  %v3974_v18 = vadd.f32 %v2816_v16, %v4973_v40  ;;  %v2366_v19 = vpop.f32.mrb[7].mxu0  ;;  %v2818_v20 = vpop.f32.mrb[7].mxu1  ;;  %3273 = vmatmul.mubr.bf16.vlgmr.msra.gmra.mrb[32].mxu0 %v2945_v3  ;;  %3370 = vmatmul.mubr.bf16.vlgmr.msra.gmra.mrb[32].mxu1 %v2947_v4  ;;  %v2889_v23 = vmax.f32 %v3940_v9, 0.0  ;;  %v2891_v24 = vmax.f32 %v3972_v10, 0.0 }
 0x1f2   :  { %v3943_v21 = vadd.f32 %v2366_v19, %v4975_v41  ;;  %v3975_v22 = vadd.f32 %v2818_v20, %v4977_v42  ;;  %v2890_v27 = vmax.f32 %v3941_v13, 0.0  ;;  %v2892_v28 = vmax.f32 %v3973_v14, 0.0 }
 0x1f3   :  { %v2893_v25 = vmax.f32 %v3942_v17, 0.0  ;;  %v2895_v26 = vmax.f32 %v3974_v18, 0.0 }
 0x1f4   :  { %v2894_v29 = vmax.f32 %v3943_v21, 0.0  ;;  %v2896_v30 = vmax.f32 %v3975_v22, 0.0 }
 0x1f5   :  { %v2949_v31 = vpack.c.bf16 %v2893_v25, %v2889_v23  ;;  %v2951_v32 = vpack.c.bf16 %v2895_v26, %v2891_v24 }
 0x1f6   :  { %v2950_v33 = vpack.c.bf16 %v2894_v29, %v2890_v27  ;;  %v2952_v34 = vpack.c.bf16 %v2896_v30, %v2892_v28  ;;  %v2370_v35 = vpop.f32.mrb[8].mxu0  ;;  %v2822_v36 = vpop.f32.mrb[8].mxu1 }
 0x1f7   :  { %v3944_v37 = vadd.f32 %v2370_v35, %v4971_v39  ;;  %v3976_v38 = vadd.f32 %v2822_v36, %v4973_v40  ;;  %v2372_v43 = vpop.f32.mrb[9].mxu0  ;;  %v2824_v44 = vpop.f32.mrb[9].mxu1 }
 0x1f8   :  { %v3945_v45 = vadd.f32 %v2372_v43, %v4975_v41  ;;  %v3977_v46 = vadd.f32 %v2824_v44, %v4977_v42  ;;  %v2374_v47 = vpop.f32.mrb[10].mxu0  ;;  %v2826_v48 = vpop.f32.mrb[10].mxu1  ;;  %3280 = vmatprep.mubr.bf16.mxu0 %v2950_v33  ;;  %3377 = vmatprep.mubr.bf16.mxu1 %v2952_v34 }
 0x1f9   :  { %v3946_v49 = vadd.f32 %v2374_v47, %v4971_v39  ;;  %v3978_v50 = vadd.f32 %v2826_v48, %v4973_v40  ;;  %v2376_v51 = vpop.f32.mrb[11].mxu0  ;;  %v2828_v52 = vpop.f32.mrb[11].mxu1  ;;  %3281 = vmatmul.mubr.bf16.gmra.mrb[36].mxu0 %v2949_v31  ;;  %3378 = vmatmul.mubr.bf16.gmra.mrb[36].mxu1 %v2951_v32  ;;  %v2897_v55 = vmax.f32 %v3944_v37, 0.0  ;;  %v2899_v56 = vmax.f32 %v3976_v38, 0.0 }
 0x1fa   :  { %v3947_v53 = vadd.f32 %v2376_v51, %v4975_v41  ;;  %v3979_v54 = vadd.f32 %v2828_v52, %v4977_v42  ;;  %v2898_v59 = vmax.f32 %v3945_v45, 0.0  ;;  %v2900_v60 = vmax.f32 %v3977_v46, 0.0 }
 0x1fb   :  { %v2901_v57 = vmax.f32 %v3946_v49, 0.0  ;;  %v2903_v58 = vmax.f32 %v3978_v50, 0.0 }
 0x1fc   :  { %v2902_v61 = vmax.f32 %v3947_v53, 0.0  ;;  %v2904_v62 = vmax.f32 %v3979_v54, 0.0 }
 0x1fd   :  { %v2953_v63 = vpack.c.bf16 %v2901_v57, %v2897_v55  ;;  %v2955_v0 = vpack.c.bf16 %v2903_v58, %v2899_v56 }
 0x1fe   :  { %v2954_v1 = vpack.c.bf16 %v2902_v61, %v2898_v59  ;;  %v2956_v2 = vpack.c.bf16 %v2904_v62, %v2900_v60  ;;  %v2380_v3 = vpop.f32.mrb[12].mxu0  ;;  %v2832_v4 = vpop.f32.mrb[12].mxu1 }
 0x1ff   :  { %v3948_v5 = vadd.f32 %v2380_v3, %v4971_v39  ;;  %v3980_v6 = vadd.f32 %v2832_v4, %v4973_v40  ;;  %v2382_v7 = vpop.f32.mrb[13].mxu0  ;;  %v2834_v8 = vpop.f32.mrb[13].mxu1 }
 0x200   :  { %v3949_v9 = vadd.f32 %v2382_v7, %v4975_v41  ;;  %v3981_v10 = vadd.f32 %v2834_v8, %v4977_v42  ;;  %v2384_v11 = vpop.f32.mrb[14].mxu0  ;;  %v2836_v12 = vpop.f32.mrb[14].mxu1  ;;  %3288 = vmatprep.mubr.bf16.mxu0 %v2954_v1  ;;  %3385 = vmatprep.mubr.bf16.mxu1 %v2956_v2 }
 0x201   :  { %v3950_v13 = vadd.f32 %v2384_v11, %v4971_v39  ;;  %v3982_v14 = vadd.f32 %v2836_v12, %v4973_v40  ;;  %v2386_v15 = vpop.f32.mrb[15].mxu0  ;;  %v2838_v16 = vpop.f32.mrb[15].mxu1  ;;  %3289 = vmatmul.mubr.bf16.gmra.mrb[40].mxu0 %v2953_v63  ;;  %3386 = vmatmul.mubr.bf16.gmra.mrb[40].mxu1 %v2955_v0  ;;  %v2905_v19 = vmax.f32 %v3948_v5, 0.0  ;;  %v2907_v20 = vmax.f32 %v3980_v6, 0.0 }
 0x202   :  { %v3951_v17 = vadd.f32 %v2386_v15, %v4975_v41  ;;  %v3983_v18 = vadd.f32 %v2838_v16, %v4977_v42  ;;  %v2906_v23 = vmax.f32 %v3949_v9, 0.0  ;;  %v2908_v24 = vmax.f32 %v3981_v10, 0.0 }
 0x203   :  { %v2909_v21 = vmax.f32 %v3950_v13, 0.0  ;;  %v2911_v22 = vmax.f32 %v3982_v14, 0.0 }
 0x204   :  { %v2910_v25 = vmax.f32 %v3951_v17, 0.0  ;;  %v2912_v26 = vmax.f32 %v3983_v18, 0.0 }
 0x205   :  { %v2957_v27 = vpack.c.bf16 %v2909_v21, %v2905_v19  ;;  %v2959_v28 = vpack.c.bf16 %v2911_v22, %v2907_v20 }
 0x206   :  { %v2958_v29 = vpack.c.bf16 %v2910_v25, %v2906_v23  ;;  %v2960_v30 = vpack.c.bf16 %v2912_v26, %v2908_v24  ;;  %v2390_v31 = vpop.f32.mrb[16].mxu0  ;;  %v2842_v32 = vpop.f32.mrb[16].mxu1 }
 0x207   :  { %v3952_v33 = vadd.f32 %v2390_v31, %v4971_v39  ;;  %v3984_v34 = vadd.f32 %v2842_v32, %v4973_v40  ;;  %v2392_v35 = vpop.f32.mrb[17].mxu0  ;;  %v2844_v36 = vpop.f32.mrb[17].mxu1 }
 0x208   :  { %v3953_v37 = vadd.f32 %v2392_v35, %v4975_v41  ;;  %v3985_v38 = vadd.f32 %v2844_v36, %v4977_v42  ;;  %v2394_v43 = vpop.f32.mrb[18].mxu0  ;;  %v2846_v44 = vpop.f32.mrb[18].mxu1  ;;  %3296 = vmatprep.mubr.bf16.mxu0 %v2958_v29  ;;  %3393 = vmatprep.mubr.bf16.mxu1 %v2960_v30 }
 0x209   :  { %v3954_v45 = vadd.f32 %v2394_v43, %v4971_v39  ;;  %v3986_v46 = vadd.f32 %v2846_v44, %v4973_v40  ;;  %v2396_v47 = vpop.f32.mrb[19].mxu0  ;;  %v2848_v48 = vpop.f32.mrb[19].mxu1  ;;  %3297 = vmatmul.mubr.bf16.gmra.mrb[44].mxu0 %v2957_v27  ;;  %3394 = vmatmul.mubr.bf16.gmra.mrb[44].mxu1 %v2959_v28  ;;  %v2913_v51 = vmax.f32 %v3952_v33, 0.0  ;;  %v2915_v52 = vmax.f32 %v3984_v34, 0.0 }
 0x20a   :  { %v3955_v49 = vadd.f32 %v2396_v47, %v4975_v41  ;;  %v3987_v50 = vadd.f32 %v2848_v48, %v4977_v42  ;;  %v2914_v55 = vmax.f32 %v3953_v37, 0.0  ;;  %v2916_v56 = vmax.f32 %v3985_v38, 0.0 }
 0x20b   :  { %v2917_v53 = vmax.f32 %v3954_v45, 0.0  ;;  %v2919_v54 = vmax.f32 %v3986_v46, 0.0 }
 0x20c   :  { %v2918_v57 = vmax.f32 %v3955_v49, 0.0  ;;  %v2920_v58 = vmax.f32 %v3987_v50, 0.0 }
 0x20d   :  { %v2961_v59 = vpack.c.bf16 %v2917_v53, %v2913_v51  ;;  %v2963_v60 = vpack.c.bf16 %v2919_v54, %v2915_v52 }
 0x20e   :  { %v2962_v61 = vpack.c.bf16 %v2918_v57, %v2914_v55  ;;  %v2964_v62 = vpack.c.bf16 %v2920_v58, %v2916_v56  ;;  %v2400_v63 = vpop.f32.mrb[20].mxu0  ;;  %v2852_v0 = vpop.f32.mrb[20].mxu1 }
 0x20f   :  { %v3956_v1 = vadd.f32 %v2400_v63, %v4971_v39  ;;  %v3988_v2 = vadd.f32 %v2852_v0, %v4973_v40  ;;  %v2402_v3 = vpop.f32.mrb[21].mxu0  ;;  %v2854_v4 = vpop.f32.mrb[21].mxu1 }
 0x210   :  { %v3957_v5 = vadd.f32 %v2402_v3, %v4975_v41  ;;  %v3989_v6 = vadd.f32 %v2854_v4, %v4977_v42  ;;  %v2404_v7 = vpop.f32.mrb[22].mxu0  ;;  %v2856_v8 = vpop.f32.mrb[22].mxu1  ;;  %3304 = vmatprep.mubr.bf16.mxu0 %v2962_v61  ;;  %3401 = vmatprep.mubr.bf16.mxu1 %v2964_v62 }
 0x211   :  { %v3958_v9 = vadd.f32 %v2404_v7, %v4971_v39  ;;  %v3990_v10 = vadd.f32 %v2856_v8, %v4973_v40  ;;  %v2406_v11 = vpop.f32.mrb[23].mxu0  ;;  %v2858_v12 = vpop.f32.mrb[23].mxu1  ;;  %3305 = vmatmul.mubr.bf16.gmra.mrb[48].mxu0 %v2961_v59  ;;  %3402 = vmatmul.mubr.bf16.gmra.mrb[48].mxu1 %v2963_v60  ;;  %v2921_v15 = vmax.f32 %v3956_v1, 0.0  ;;  %v2923_v16 = vmax.f32 %v3988_v2, 0.0 }
 0x212   :  { %v3959_v13 = vadd.f32 %v2406_v11, %v4975_v41  ;;  %v3991_v14 = vadd.f32 %v2858_v12, %v4977_v42  ;;  %v2922_v19 = vmax.f32 %v3957_v5, 0.0  ;;  %v2924_v20 = vmax.f32 %v3989_v6, 0.0 }
 0x213   :  { %v2925_v17 = vmax.f32 %v3958_v9, 0.0  ;;  %v2927_v18 = vmax.f32 %v3990_v10, 0.0 }
 0x214   :  { %v2926_v21 = vmax.f32 %v3959_v13, 0.0  ;;  %v2928_v22 = vmax.f32 %v3991_v14, 0.0 }
 0x215   :  { %v2965_v23 = vpack.c.bf16 %v2925_v17, %v2921_v15  ;;  %v2967_v24 = vpack.c.bf16 %v2927_v18, %v2923_v16 }
 0x216   :  { %v2966_v25 = vpack.c.bf16 %v2926_v21, %v2922_v19  ;;  %v2968_v26 = vpack.c.bf16 %v2928_v22, %v2924_v20  ;;  %v2410_v27 = vpop.f32.mrb[24].mxu0  ;;  %v2862_v28 = vpop.f32.mrb[24].mxu1 }
 0x217   :  { %v3960_v29 = vadd.f32 %v2410_v27, %v4971_v39  ;;  %v3992_v30 = vadd.f32 %v2862_v28, %v4973_v40  ;;  %v2412_v31 = vpop.f32.mrb[25].mxu0  ;;  %v2864_v32 = vpop.f32.mrb[25].mxu1 }
 0x218   :  { %v3961_v33 = vadd.f32 %v2412_v31, %v4975_v41  ;;  %v3993_v34 = vadd.f32 %v2864_v32, %v4977_v42  ;;  %v2414_v35 = vpop.f32.mrb[26].mxu0  ;;  %v2866_v36 = vpop.f32.mrb[26].mxu1  ;;  %3312 = vmatprep.mubr.bf16.mxu0 %v2966_v25  ;;  %3409 = vmatprep.mubr.bf16.mxu1 %v2968_v26 }
 0x219   :  { %v3962_v37 = vadd.f32 %v2414_v35, %v4971_v39  ;;  %v3994_v38 = vadd.f32 %v2866_v36, %v4973_v40  ;;  %v2416_v43 = vpop.f32.mrb[27].mxu0  ;;  %v2868_v44 = vpop.f32.mrb[27].mxu1  ;;  %3313 = vmatmul.mubr.bf16.gmra.mrb[52].mxu0 %v2965_v23  ;;  %3410 = vmatmul.mubr.bf16.gmra.mrb[52].mxu1 %v2967_v24  ;;  %v2929_v47 = vmax.f32 %v3960_v29, 0.0  ;;  %v2931_v48 = vmax.f32 %v3992_v30, 0.0 }
 0x21a   :  { %v3963_v45 = vadd.f32 %v2416_v43, %v4975_v41  ;;  %v3995_v46 = vadd.f32 %v2868_v44, %v4977_v42  ;;  %v2930_v51 = vmax.f32 %v3961_v33, 0.0  ;;  %v2932_v52 = vmax.f32 %v3993_v34, 0.0 }
 0x21b   :  { %v2933_v49 = vmax.f32 %v3962_v37, 0.0  ;;  %v2935_v50 = vmax.f32 %v3994_v38, 0.0 }
 0x21c   :  { %v2934_v53 = vmax.f32 %v3963_v45, 0.0  ;;  %v2936_v54 = vmax.f32 %v3995_v46, 0.0 }
 0x21d   :  { %v2969_v55 = vpack.c.bf16 %v2933_v49, %v2929_v47  ;;  %v2971_v56 = vpack.c.bf16 %v2935_v50, %v2931_v48 }
 0x21e   :  { %v2970_v57 = vpack.c.bf16 %v2934_v53, %v2930_v51  ;;  %v2972_v58 = vpack.c.bf16 %v2936_v54, %v2932_v52  ;;  %v2420_v59 = vpop.f32.mrb[28].mxu0  ;;  %v2872_v60 = vpop.f32.mrb[28].mxu1 }
 0x21f   :  { %v3964_v61 = vadd.f32 %v2420_v59, %v4971_v39  ;;  %v3996_v62 = vadd.f32 %v2872_v60, %v4973_v40  ;;  %v2422_v63 = vpop.f32.mrb[29].mxu0  ;;  %v2874_v0 = vpop.f32.mrb[29].mxu1 }
 0x220   :  { %v3965_v1 = vadd.f32 %v2422_v63, %v4975_v41  ;;  %v3997_v2 = vadd.f32 %v2874_v0, %v4977_v42  ;;  %v2424_v3 = vpop.f32.mrb[30].mxu0  ;;  %v2876_v4 = vpop.f32.mrb[30].mxu1  ;;  %3320 = vmatprep.mubr.bf16.mxu0 %v2970_v57  ;;  %3417 = vmatprep.mubr.bf16.mxu1 %v2972_v58 }
 0x221   :  { %v3966_v5 = vadd.f32 %v2424_v3, %v4971_v39  ;;  %v3998_v6 = vadd.f32 %v2876_v4, %v4973_v40  ;;  %v2426_v7 = vpop.f32.mrb[31].mxu0  ;;  %v2878_v8 = vpop.f32.mrb[31].mxu1  ;;  %3321 = vmatmul.mubr.bf16.gmra.mrb[56].mxu0 %v2969_v55  ;;  %3418 = vmatmul.mubr.bf16.gmra.mrb[56].mxu1 %v2971_v56  ;;  %v2937_v11 = vmax.f32 %v3964_v61, 0.0  ;;  %v2939_v12 = vmax.f32 %v3996_v62, 0.0 }
 0x222   :  { %v3967_v9 = vadd.f32 %v2426_v7, %v4975_v41  ;;  %v3999_v10 = vadd.f32 %v2878_v8, %v4977_v42  ;;  %v2938_v15 = vmax.f32 %v3965_v1, 0.0  ;;  %v2940_v16 = vmax.f32 %v3997_v2, 0.0  ;;  %v5046_v42 = vld [vmem:[%s5116_s4] ss:$0 sm:$0xff] }
 0x223   :  { %v2941_v13 = vmax.f32 %v3966_v5, 0.0  ;;  %v2943_v14 = vmax.f32 %v3998_v6, 0.0 }
 0x224   :  { %v2942_v17 = vmax.f32 %v3967_v9, 0.0  ;;  %v2944_v18 = vmax.f32 %v3999_v10, 0.0 }
 0x225   :  { %v2973_v19 = vpack.c.bf16 %v2941_v13, %v2937_v11  ;;  %v2975_v39 = vpack.c.bf16 %v2943_v14, %v2939_v12 }
 0x226   :  { %v2974_v20 = vpack.c.bf16 %v2942_v17, %v2938_v15  ;;  %v2976_v40 = vpack.c.bf16 %v2944_v18, %v2940_v16 }
 0x228   :  { %3328 = vmatprep.mubr.bf16.mxu0 %v2974_v20  ;;  %3425 = vmatprep.mubr.bf16.mxu1 %v2976_v40 }
 0x229   :  { %3329 = vmatmul.mubr.bf16.gmra.mrb[60].mxu0 %v2973_v19  ;;  %3426 = vmatmul.mubr.bf16.gmra.mrb[60].mxu1 %v2975_v39 }
 0x2c4   :  { %v3824_v21 = vpop.f32.mrb[32].mxu0  ;;  %v3888_v41 = vpop.f32.mrb[32].mxu1 }
 0x2c5   :  { %v3825_v22 = vpop.f32.mrb[33].mxu0  ;;  %v3889_v23 = vpop.f32.mrb[33].mxu1 }
 0x2c6   :  { %v3826_v24 = vadd.f32 %v3825_v22, %v3824_v21  ;;  %v3890_v25 = vadd.f32 %v3889_v23, %v3888_v41  ;;  %v3827_v26 = vpop.f32.mrb[34].mxu0  ;;  %v3891_v27 = vpop.f32.mrb[34].mxu1 }
 0x2c7   :  { %v3828_v28 = vpop.f32.mrb[35].mxu0  ;;  %v3892_v29 = vpop.f32.mrb[35].mxu1 }
 0x2c8   :  { %v3275_v30 = vadd.f32 %v3826_v24, %v5046_v42  ;;  %v3829_v31 = vadd.f32 %v3828_v28, %v3827_v26  ;;  %v3893_v32 = vadd.f32 %v3892_v29, %v3891_v27 }
 0x2ca   :  { %v3372_v33 = vadd.f32 %v3890_v25, %v3275_v30  ;;  %v3278_v34 = vadd.f32 %v3829_v31, %v5046_v42 }
 0x2cc   :  { %3434 = vst [vmem:[%s5117_s5] sm:$0xff] %v3372_v33  ;;  %v3375_v35 = vadd.f32 %v3893_v32, %v3278_v34  ;;  %v3830_v36 = vpop.f32.mrb[36].mxu0  ;;  %v3894_v37 = vpop.f32.mrb[36].mxu1 }
 0x2cd   :  { %v3831_v38 = vpop.f32.mrb[37].mxu0  ;;  %v3895_v43 = vpop.f32.mrb[37].mxu1 }
 0x2ce   :  { %3435 = vst [vmem:[%s5117_s5 + $0x8] sm:$0xff] %v3375_v35  ;;  %v3832_v44 = vadd.f32 %v3831_v38, %v3830_v36  ;;  %v3896_v45 = vadd.f32 %v3895_v43, %v3894_v37  ;;  %v3833_v46 = vpop.f32.mrb[38].mxu0  ;;  %v3897_v47 = vpop.f32.mrb[38].mxu1 }
 0x2cf   :  { %v3834_v48 = vpop.f32.mrb[39].mxu0  ;;  %v3898_v49 = vpop.f32.mrb[39].mxu1 }
 0x2d0   :  { %v3283_v50 = vadd.f32 %v3832_v44, %v5046_v42  ;;  %v3835_v51 = vadd.f32 %v3834_v48, %v3833_v46  ;;  %v3899_v52 = vadd.f32 %v3898_v49, %v3897_v47 }
 0x2d2   :  { %v3380_v53 = vadd.f32 %v3896_v45, %v3283_v50  ;;  %v3286_v54 = vadd.f32 %v3835_v51, %v5046_v42 }
 0x2d4   :  { %3436 = vst [vmem:[%s5117_s5 + $0x10] sm:$0xff] %v3380_v53  ;;  %v3383_v55 = vadd.f32 %v3899_v52, %v3286_v54  ;;  %v3836_v56 = vpop.f32.mrb[40].mxu0  ;;  %v3900_v57 = vpop.f32.mrb[40].mxu1 }
 0x2d5   :  { %v3837_v58 = vpop.f32.mrb[41].mxu0  ;;  %v3901_v59 = vpop.f32.mrb[41].mxu1 }
 0x2d6   :  { %3437 = vst [vmem:[%s5117_s5 + $0x18] sm:$0xff] %v3383_v55  ;;  %v3838_v60 = vadd.f32 %v3837_v58, %v3836_v56  ;;  %v3902_v61 = vadd.f32 %v3901_v59, %v3900_v57  ;;  %v3839_v62 = vpop.f32.mrb[42].mxu0  ;;  %v3903_v63 = vpop.f32.mrb[42].mxu1 }
 0x2d7   :  { %v3840_v0 = vpop.f32.mrb[43].mxu0  ;;  %v3904_v1 = vpop.f32.mrb[43].mxu1 }
 0x2d8   :  { %v3291_v2 = vadd.f32 %v3838_v60, %v5046_v42  ;;  %v3841_v3 = vadd.f32 %v3840_v0, %v3839_v62  ;;  %v3905_v4 = vadd.f32 %v3904_v1, %v3903_v63 }
 0x2da   :  { %v3388_v5 = vadd.f32 %v3902_v61, %v3291_v2  ;;  %v3294_v6 = vadd.f32 %v3841_v3, %v5046_v42 }
 0x2dc   :  { %3438 = vst [vmem:[%s5117_s5 + $0x20] sm:$0xff] %v3388_v5  ;;  %v3391_v7 = vadd.f32 %v3905_v4, %v3294_v6  ;;  %v3842_v8 = vpop.f32.mrb[44].mxu0  ;;  %v3906_v9 = vpop.f32.mrb[44].mxu1 }
 0x2dd   :  { %v3843_v10 = vpop.f32.mrb[45].mxu0  ;;  %v3907_v11 = vpop.f32.mrb[45].mxu1 }
 0x2de   :  { %3439 = vst [vmem:[%s5117_s5 + $0x28] sm:$0xff] %v3391_v7  ;;  %v3844_v12 = vadd.f32 %v3843_v10, %v3842_v8  ;;  %v3908_v13 = vadd.f32 %v3907_v11, %v3906_v9  ;;  %v3845_v14 = vpop.f32.mrb[46].mxu0  ;;  %v3909_v15 = vpop.f32.mrb[46].mxu1 }
 0x2df   :  { %v3846_v16 = vpop.f32.mrb[47].mxu0  ;;  %v3910_v17 = vpop.f32.mrb[47].mxu1 }
 0x2e0   :  { %v3299_v18 = vadd.f32 %v3844_v12, %v5046_v42  ;;  %v3847_v19 = vadd.f32 %v3846_v16, %v3845_v14  ;;  %v3911_v39 = vadd.f32 %v3910_v17, %v3909_v15 }
 0x2e2   :  { %v3396_v20 = vadd.f32 %v3908_v13, %v3299_v18  ;;  %v3302_v40 = vadd.f32 %v3847_v19, %v5046_v42 }
 0x2e4   :  { %3440 = vst [vmem:[%s5117_s5 + $0x30] sm:$0xff] %v3396_v20  ;;  %v3399_v21 = vadd.f32 %v3911_v39, %v3302_v40  ;;  %v3848_v41 = vpop.f32.mrb[48].mxu0  ;;  %v3912_v22 = vpop.f32.mrb[48].mxu1 }
 0x2e5   :  { %v3849_v23 = vpop.f32.mrb[49].mxu0  ;;  %v3913_v24 = vpop.f32.mrb[49].mxu1 }
 0x2e6   :  { %3441 = vst [vmem:[%s5117_s5 + $0x38] sm:$0xff] %v3399_v21  ;;  %v3850_v25 = vadd.f32 %v3849_v23, %v3848_v41  ;;  %v3914_v26 = vadd.f32 %v3913_v24, %v3912_v22  ;;  %v3851_v27 = vpop.f32.mrb[50].mxu0  ;;  %v3915_v28 = vpop.f32.mrb[50].mxu1 }
 0x2e7   :  { %v3852_v29 = vpop.f32.mrb[51].mxu0  ;;  %v3916_v30 = vpop.f32.mrb[51].mxu1 }
 0x2e8   :  { %v3307_v31 = vadd.f32 %v3850_v25, %v5046_v42  ;;  %v3853_v32 = vadd.f32 %v3852_v29, %v3851_v27  ;;  %v3917_v33 = vadd.f32 %v3916_v30, %v3915_v28 }
 0x2ea   :  { %v3404_v34 = vadd.f32 %v3914_v26, %v3307_v31  ;;  %v3310_v35 = vadd.f32 %v3853_v32, %v5046_v42 }
 0x2ec   :  { %3442 = vst [vmem:[%s5117_s5 + $0x40] sm:$0xff] %v3404_v34  ;;  %v3407_v36 = vadd.f32 %v3917_v33, %v3310_v35  ;;  %v3854_v37 = vpop.f32.mrb[52].mxu0  ;;  %v3918_v38 = vpop.f32.mrb[52].mxu1 }
 0x2ed   :  { %v3855_v43 = vpop.f32.mrb[53].mxu0  ;;  %v3919_v44 = vpop.f32.mrb[53].mxu1 }
 0x2ee   :  { %3443 = vst [vmem:[%s5117_s5 + $0x48] sm:$0xff] %v3407_v36  ;;  %v3856_v45 = vadd.f32 %v3855_v43, %v3854_v37  ;;  %v3920_v46 = vadd.f32 %v3919_v44, %v3918_v38  ;;  %v3857_v47 = vpop.f32.mrb[54].mxu0  ;;  %v3921_v48 = vpop.f32.mrb[54].mxu1 }
 0x2ef   :  { %v3858_v49 = vpop.f32.mrb[55].mxu0  ;;  %v3922_v50 = vpop.f32.mrb[55].mxu1 }
 0x2f0   :  { %v3315_v51 = vadd.f32 %v3856_v45, %v5046_v42  ;;  %v3859_v52 = vadd.f32 %v3858_v49, %v3857_v47  ;;  %v3923_v53 = vadd.f32 %v3922_v50, %v3921_v48 }
 0x2f2   :  { %v3412_v54 = vadd.f32 %v3920_v46, %v3315_v51  ;;  %v3318_v55 = vadd.f32 %v3859_v52, %v5046_v42 }
 0x2f4   :  { %3444 = vst [vmem:[%s5117_s5 + $0x50] sm:$0xff] %v3412_v54  ;;  %v3415_v56 = vadd.f32 %v3923_v53, %v3318_v55  ;;  %v3860_v57 = vpop.f32.mrb[56].mxu0  ;;  %v3924_v58 = vpop.f32.mrb[56].mxu1 }
 0x2f5   :  { %v3861_v59 = vpop.f32.mrb[57].mxu0  ;;  %v3925_v60 = vpop.f32.mrb[57].mxu1 }
 0x2f6   :  { %3445 = vst [vmem:[%s5117_s5 + $0x58] sm:$0xff] %v3415_v56  ;;  %v3862_v61 = vadd.f32 %v3861_v59, %v3860_v57  ;;  %v3926_v62 = vadd.f32 %v3925_v60, %v3924_v58  ;;  %v3863_v63 = vpop.f32.mrb[58].mxu0  ;;  %v3927_v0 = vpop.f32.mrb[58].mxu1 }
 0x2f7   :  { %v3864_v1 = vpop.f32.mrb[59].mxu0  ;;  %v3928_v2 = vpop.f32.mrb[59].mxu1 }
 0x2f8   :  { %v3323_v3 = vadd.f32 %v3862_v61, %v5046_v42  ;;  %v3865_v4 = vadd.f32 %v3864_v1, %v3863_v63  ;;  %v3929_v5 = vadd.f32 %v3928_v2, %v3927_v0 }
 0x2fa   :  { %v3420_v6 = vadd.f32 %v3926_v62, %v3323_v3  ;;  %v3326_v7 = vadd.f32 %v3865_v4, %v5046_v42 }
 0x2fc   :  { %3446 = vst [vmem:[%s5117_s5 + $0x60] sm:$0xff] %v3420_v6  ;;  %v3423_v8 = vadd.f32 %v3929_v5, %v3326_v7  ;;  %v3866_v9 = vpop.f32.mrb[60].mxu0  ;;  %v3930_v10 = vpop.f32.mrb[60].mxu1 }
 0x2fd   :  { %v3867_v11 = vpop.f32.mrb[61].mxu0  ;;  %v3931_v12 = vpop.f32.mrb[61].mxu1 }
 0x2fe   :  { %3447 = vst [vmem:[%s5117_s5 + $0x68] sm:$0xff] %v3423_v8  ;;  %v3868_v13 = vadd.f32 %v3867_v11, %v3866_v9  ;;  %v3932_v14 = vadd.f32 %v3931_v12, %v3930_v10  ;;  %v3869_v15 = vpop.f32.mrb[62].mxu0  ;;  %v3933_v16 = vpop.f32.mrb[62].mxu1 }
 0x2ff   :  { %v3870_v17 = vpop.f32.mrb[63].mxu0  ;;  %v3934_v18 = vpop.f32.mrb[63].mxu1 }
 0x300   :  { %v3331_v19 = vadd.f32 %v3868_v13, %v5046_v42  ;;  %v3871_v39 = vadd.f32 %v3870_v17, %v3869_v15  ;;  %v3935_v20 = vadd.f32 %v3934_v18, %v3933_v16 }
 0x302   :  { %v3428_v40 = vadd.f32 %v3932_v14, %v3331_v19  ;;  %v3334_v21 = vadd.f32 %v3871_v39, %v5046_v42 }
 0x304   :  { %3448 = vst [vmem:[%s5117_s5 + $0x70] sm:$0xff] %v3428_v40  ;;  %v3431_v41 = vadd.f32 %v3935_v20, %v3334_v21 }
 0x306   :  { %3449 = vst [vmem:[%s5117_s5 + $0x78] sm:$0xff] %v3431_v41 }
 0x307   :  { %3454 = vsyncpa [#allocation3], 1 }

</bundles_post_ra>
